<compile_context>
chip_gen: v5e
topology: v5e:2x2
jax: 0.10.0
libtpu: 0.0.40
codegen_flags: <defaults>
</compile_context>

<pallas_src>
import functools

import jax
import jax.numpy as jnp
import numpy as np
from jax.experimental import pallas as pl
from jax.experimental.pallas import tpu as pltpu

# ----------------------------- configuration --------------------------------
MIDDIM = 1280              # self.middim[0] (efficientnet-b0)
LABEL_DIM = 16             # label_dim (small for the synthetic example)
HEAD_NUM = 4               # multi-head attention
HL = HEAD_NUM * LABEL_DIM  # 64
STEM_CH = 32               # EfficientNet-B0 stem output channels
POOL_F = 4                 # AvgPool2d((4, 1)) freq window
F_NEED = 2 * POOL_F        # input freq rows feeding pool window 0
F_ROWS = F_NEED + 2        # + 1 zero-pad row on each side -> 10
TAPS_PAD = 32              # 3 time taps * 10 padded freq rows, padded to 32
EPS = 1e-7

BATCH = 2
TIME = 32                  # input time frames  -> T' = 16 stem frames
FREQ = 16                  # input mel bins (only rows < F_NEED are read)
T_TILE = 8                 # stem-output time frames per grid step (2 tiles)


# ------------------------------ Pallas kernel --------------------------------
def _effnet_attention_kernel(x_ref, sw_ref, sb_ref, hw_ref, hb_ref,
                             aw_ref, ab_ref, o_ref, s_att_ref, s_ac_ref,
                             *, t_tile):
    """Fused stem conv -> 1x1 projection -> freq AvgPool -> streamed attention.

    x_ref : (1, 1, t_tile, 32) f32   time-tap folded stem input for this tile
    sw_ref: (32, 128)          bf16  packed stem weights (4 output freq rows)
    sb_ref: (1, 128)           f32   stem bias, tiled per freq row
    hw_ref: (32, 1280)         bf16  1x1 head projection weight
    hb_ref: (1, 1280)          f32   1x1 head projection bias
    aw_ref: (1280, 128)        bf16  packed [att heads | cla heads] weights
    ab_ref: (1, 128)           f32   packed [att heads | cla heads] biases
    o_ref : (1, 1, 64)         f32   per-head time-pooled scores (per batch)
    s_att_ref / s_ac_ref: (1, 64) f32 scratch: running sum(att), sum(att*cla)
    """
    jt = pl.program_id(1)

    @pl.when(jt == 0)
    def _init():
        s_att_ref[...] = jnp.zeros_like(s_att_ref)
        s_ac_ref[...] = jnp.zeros_like(s_ac_ref)

    # ---- stem conv: all 4 freq rows feeding pool window 0 in ONE matmul ----
    x = x_ref[0, 0].astype(jnp.bfloat16)                    # (t_tile, 32)
    stem = jnp.dot(x, sw_ref[...], preferred_element_type=jnp.float32)
    stem = stem + sb_ref[...]
    stem = stem * jax.nn.sigmoid(stem)                       # SiLU (f32)

    # ---- 1x1 projection to MIDDIM + SiLU, AvgPool((4,1)) over freq ---------
    # Pooling happens AFTER the nonlinearity, so process the 4 freq rows
    # separately (static unroll) and accumulate, then cast to bf16 once.
    pooled = jnp.zeros((t_tile, MIDDIM), jnp.float32)
    for f in range(POOL_F):
        sf = stem[:, f * STEM_CH:(f + 1) * STEM_CH].astype(jnp.bfloat16)
        y = jnp.dot(sf, hw_ref[...], preferred_element_type=jnp.float32)
        y = y + hb_ref[...]
        pooled = pooled + y * jax.nn.sigmoid(y)
    pooled = (pooled * (1.0 / POOL_F)).astype(jnp.bfloat16)  # (t_tile, 1280)

    # ---- all 4 att + 4 cla heads as ONE lane-dense matmul ------------------
    z = jnp.dot(pooled, aw_ref[...], preferred_element_type=jnp.float32)
    z = z + ab_ref[...]                                      # (t_tile, 128)
    s = jax.nn.sigmoid(z)
    att = jnp.clip(s[:, :HL], EPS, 1.0 - EPS)
    cla = s[:, HL:]

    # ---- streamed attention pooling over the time axis ---------------------
    s_att_ref[...] += jnp.sum(att, axis=0, keepdims=True)
    s_ac_ref[...] += jnp.sum(att * cla, axis=0, keepdims=True)

    @pl.when(jt == pl.num_programs(1) - 1)
    def _finalize():
        out = s_ac_ref[...] * pl.reciprocal(s_att_ref[...])
        o_ref[...] = out.reshape(1, 1, HL)


# ---------------------------- glue (plain JAX) -------------------------------
def build_stem_input(x, t_tile):
    """Fold the 3 time taps of the stride-2 stem conv into a 32-wide dim.

    Only the F_NEED freq rows feeding AvgPool window 0 are read.
    Returns (B, num_tiles, t_tile, 32) f32 plus the tile count.
    """
    b, t, f = x.shape
    assert f >= F_NEED, (f, F_NEED)
    # x.unsqueeze(1).transpose(2,3): NCHW (B,1,F,T) == freq-major (B, F, T)
    x_f = jnp.transpose(x[:, :, :F_NEED], (0, 2, 1))          # (B, 8, T)
    xp = jnp.pad(x_f, ((0, 0), (1, 1), (1, 1)))               # (B, 10, T+2)
    t_out = (t - 1) // 2 + 1
    cols = [xp[:, :, dj:dj + 2 * (t_out - 1) + 1:2] for dj in range(3)]
    xf = jnp.concatenate(cols, axis=1)                        # (B, 30, T')
    xf = jnp.pad(xf, ((0, 0), (0, TAPS_PAD - 3 * F_ROWS), (0, 0)))
    xf = jnp.transpose(xf, (0, 2, 1))                         # (B, T', 32)
    assert t_out % t_tile == 0, (t_out, t_tile)
    nt = t_out // t_tile
    return xf.reshape(b, nt, t_tile, TAPS_PAD), nt


@functools.partial(jax.jit, static_argnames=("t_tile", "nframes"))
def effnet_attention_forward(x, packed, t_tile=T_TILE, nframes=1056):
    """Fused Pallas forward.  x: (B, time, freq) f32 -> (B, label_dim)."""
    del nframes  # unused, as in the PyTorch module
    b = x.shape[0]
    xfold, nt = build_stem_input(x, t_tile)

    kernel = functools.partial(_effnet_attention_kernel, t_tile=t_tile)
    grid_spec = pltpu.PrefetchScalarGridSpec(
        num_scalar_prefetch=0,
        grid=(b, nt),
        in_specs=[
            # streamed activation rows
            pl.BlockSpec((1, 1, t_tile, TAPS_PAD), lambda i, j: (i, j, 0, 0)),
            # weights: full-array blocks, constant index maps -> DMA'd once,
            # VMEM-resident across all grid steps.
            pl.BlockSpec((TAPS_PAD, POOL_F * STEM_CH), lambda i, j: (0, 0)),
            pl.BlockSpec((1, POOL_F * STEM_CH), lambda i, j: (0, 0)),
            pl.BlockSpec((STEM_CH, MIDDIM), lambda i, j: (0, 0)),
            pl.BlockSpec((1, MIDDIM), lambda i, j: (0, 0)),
            pl.BlockSpec((MIDDIM, 2 * HL), lambda i, j: (0, 0)),
            pl.BlockSpec((1, 2 * HL), lambda i, j: (0, 0)),
        ],
        out_specs=pl.BlockSpec((1, 1, HL), lambda i, j: (i, 0, 0)),
        scratch_shapes=[pltpu.VMEM((1, HL), jnp.float32),
                        pltpu.VMEM((1, HL), jnp.float32)],
    )
    per_head = pl.pallas_call(
        kernel,
        out_shape=jax.ShapeDtypeStruct((b, 1, HL), jnp.float32),
        grid_spec=grid_spec,
        compiler_params=pltpu.CompilerParams(
            dimension_semantics=("parallel", "arbitrary"),
            vmem_limit_bytes=32 * 1024 * 1024),
    )(xfold, packed["stem_w_p"], packed["stem_b_p"],
      packed["head_w_p"], packed["head_b_p"],
      packed["att_cla_w_p"], packed["att_cla_b_p"])

    # Trivial head-weighted reduction kept in the wrapper.
    per_head = per_head.reshape(b, HEAD_NUM, LABEL_DIM)
    return jnp.einsum("bhl,h->bl", per_head, packed["head_weight"][0])


# ----------------------------- parameters ------------------------------------
def make_params(key):
    ks = jax.random.split(key, 8)
    return {
        # stem conv taps (3, 3, 32); BN identity at init, folded.
        "stem_w": 0.1 * jax.random.normal(ks[0], (3, 3, STEM_CH), jnp.float32),
        "stem_b": 0.02 * jax.random.normal(ks[1], (STEM_CH,), jnp.float32),
        # 1x1 head projection to middim
        "head_w": 0.05 * jax.random.normal(ks[2], (STEM_CH, MIDDIM), jnp.float32),
        "head_b": 0.02 * jax.random.normal(ks[3], (MIDDIM,), jnp.float32),
        # MHeadAttention per-head 1x1 convs (stored as (H, C, L) for x @ W)
        "att_w": 0.05 * jax.random.normal(ks[4], (HEAD_NUM, MIDDIM, LABEL_DIM), jnp.float32),
        "att_b": 0.01 * jax.random.normal(ks[5], (HEAD_NUM, LABEL_DIM), jnp.float32),
        "cla_w": 0.05 * jax.random.normal(ks[6], (HEAD_NUM, MIDDIM, LABEL_DIM), jnp.float32),
        "cla_b": 0.01 * jax.random.normal(ks[7], (HEAD_NUM, LABEL_DIM), jnp.float32),
        "head_weight": jnp.full((1, HEAD_NUM), 1.0 / HEAD_NUM, jnp.float32),
    }


def pack_params(raw):
    """One-time repack into the kernel's lane-dense layouts (parameter-load
    time; hoisted out of the jit'd forward)."""
    # Stem weights: Wp[dj*10 + 2*f' + di, f'*32 + c] = W[di, dj, c] so that
    # (t_tile, 32) @ Wp gives all POOL_F stem freq rows side by side.
    w = np.asarray(raw["stem_w"], np.float32)
    wp = np.zeros((TAPS_PAD, POOL_F * STEM_CH), np.float32)
    for f in range(POOL_F):
        for di in range(3):
            for dj in range(3):
                row = dj * F_ROWS + 2 * f + di
                wp[row, f * STEM_CH:(f + 1) * STEM_CH] = w[di, dj]
    att_w = jnp.transpose(raw["att_w"], (1, 0, 2)).reshape(MIDDIM, HL)
    cla_w = jnp.transpose(raw["cla_w"], (1, 0, 2)).reshape(MIDDIM, HL)
    return {
        "stem_w_p": jnp.asarray(wp, jnp.bfloat16),
        "stem_b_p": jnp.tile(raw["stem_b"].reshape(1, STEM_CH), (1, POOL_F)),
        "head_w_p": raw["head_w"].astype(jnp.bfloat16),
        "head_b_p": raw["head_b"].reshape(1, MIDDIM),
        "att_cla_w_p": jnp.concatenate([att_w, cla_w], axis=1).astype(jnp.bfloat16),
        "att_cla_b_p": jnp.concatenate([raw["att_b"].reshape(1, HL),
                                        raw["cla_b"].reshape(1, HL)], axis=1),
        "head_weight": raw["head_weight"],
    }


# ------------------------------ reference ------------------------------------
def reference_forward(x, raw):
    """Pure-JAX reference from the RAW (unpacked) params, mirroring the kernel
    math (same bf16 rounding of matmul operands)."""
    b, t, _ = x.shape
    bf = lambda a: a.astype(jnp.bfloat16).astype(jnp.float32)
    x_f = jnp.transpose(x[:, :, :F_NEED], (0, 2, 1))
    xp = jnp.pad(x_f, ((0, 0), (1, 1), (1, 1)))
    t_out = (t - 1) // 2 + 1
    hw = raw["head_w"].astype(jnp.bfloat16)
    pooled = jnp.zeros((b, t_out, MIDDIM), jnp.float32)
    for f in range(POOL_F):
        acc = jnp.zeros((b, t_out, STEM_CH), jnp.float32)
        for di in range(3):
            for dj in range(3):
                patch = xp[:, 2 * f + di, dj:dj + 2 * (t_out - 1) + 1:2]
                acc = acc + bf(patch)[..., None] * bf(raw["stem_w"][di, dj])
        acc = acc + raw["stem_b"]
        acc = acc * jax.nn.sigmoid(acc)
        y = jnp.dot(acc.astype(jnp.bfloat16), hw,
                    preferred_element_type=jnp.float32) + raw["head_b"]
        pooled = pooled + y * jax.nn.sigmoid(y)
    pooled = pooled * (1.0 / POOL_F)
    xb = pooled.astype(jnp.bfloat16)
    out = jnp.zeros((b, LABEL_DIM), jnp.float32)
    for h in range(HEAD_NUM):
        att = jax.nn.sigmoid(
            jnp.dot(xb, raw["att_w"][h].astype(jnp.bfloat16),
                    preferred_element_type=jnp.float32) + raw["att_b"][h])
        att = jnp.clip(att, EPS, 1.0 - EPS)
        norm_att = att * (1.0 / jnp.sum(att, axis=1, keepdims=True))
        cla = jax.nn.sigmoid(
            jnp.dot(xb, raw["cla_w"][h].astype(jnp.bfloat16),
                    preferred_element_type=jnp.float32) + raw["cla_b"][h])
        out = out + raw["head_weight"][0, h] * jnp.sum(norm_att * cla, axis=1)
    return out


if __name__ == "__main__":
    key = jax.random.PRNGKey(0)
    k_in, k_par = jax.random.split(key)
    x = jax.random.normal(k_in, (BATCH, TIME, FREQ), jnp.float32)
    raw = make_params(k_par)
    packed = pack_params(raw)          # one-time repack, outside the jit

    out = effnet_attention_forward(x, packed, t_tile=T_TILE)
    out = jax.block_until_ready(out)

    ref = reference_forward(x, raw)
    assert out.shape == (BATCH, LABEL_DIM), out.shape
    err = float(jnp.max(jnp.abs(out - ref)))
    assert err < 2e-3, err
    print("KERNEL_OK")
</pallas_src>

<mosaic_0001>
module attributes {stable_mosaic.version = 11 : i64} {
  func.func @_effnet_attention_kernel(%arg0: i32, %arg1: i32, %arg2: memref<1x1x8x32xf32, #tpu.memory_space<vmem>>, %arg3: memref<32x128xbf16, #tpu.memory_space<vmem>>, %arg4: memref<1x128xf32, #tpu.memory_space<vmem>>, %arg5: memref<32x1280xbf16, #tpu.memory_space<vmem>>, %arg6: memref<1x1280xf32, #tpu.memory_space<vmem>>, %arg7: memref<1280x128xbf16, #tpu.memory_space<vmem>>, %arg8: memref<1x128xf32, #tpu.memory_space<vmem>>, %arg9: memref<1x1x64xf32, #tpu.memory_space<vmem>>, %arg10: memref<1x64xf32, #tpu.memory_space<vmem>>, %arg11: memref<1x64xf32, #tpu.memory_space<vmem>>) attributes {dimension_semantics = [#tpu.dimension_semantics<parallel>, #tpu.dimension_semantics<arbitrary>], iteration_bounds = array<i64: 2, 2>, scalar_prefetch = 0 : i64, scratch_operands = 2 : i64, tpu.core_type = #tpu.core_type<tc>, window_params = [{transform_indices = @transform_0, window_bounds = array<i64: 1, 1, 8, 32>}, {pipeline_mode = #tpu.pipeline_mode<synchronous>, transform_indices = @transform_1, window_bounds = array<i64: 32, 128>}, {pipeline_mode = #tpu.pipeline_mode<synchronous>, transform_indices = @transform_2, window_bounds = array<i64: 1, 128>}, {pipeline_mode = #tpu.pipeline_mode<synchronous>, transform_indices = @transform_3, window_bounds = array<i64: 32, 1280>}, {pipeline_mode = #tpu.pipeline_mode<synchronous>, transform_indices = @transform_4, window_bounds = array<i64: 1, 1280>}, {pipeline_mode = #tpu.pipeline_mode<synchronous>, transform_indices = @transform_5, window_bounds = array<i64: 1280, 128>}, {pipeline_mode = #tpu.pipeline_mode<synchronous>, transform_indices = @transform_6, window_bounds = array<i64: 1, 128>}, {transform_indices = @transform_7, window_bounds = array<i64: 1, 1, 64>}]} {
    %c0_i32 = arith.constant 0 : i32
    %0 = arith.cmpi eq, %arg1, %c0_i32 : i32
    %1 = arith.extui %0 : i1 to i32
    %c0_i32_0 = arith.constant 0 : i32
    %2 = arith.cmpi ne, %1, %c0_i32_0 : i32
    scf.if %2 {
      %cst_54 = arith.constant 0.000000e+00 : f32
      %107 = vector.broadcast %cst_54 : f32 to vector<1x64xf32>
      %c0_55 = arith.constant 0 : index
      %c0_56 = arith.constant 0 : index
      %108 = vector.load %arg10[%c0_55, %c0_56] : memref<1x64xf32, #tpu.memory_space<vmem>>, vector<1x64xf32>
      tpu.vector_store %arg10[%c0_55, %c0_56], %107 {strides = array<i32>} : memref<1x64xf32, #tpu.memory_space<vmem>>, vector<1x64xf32>,
      %cst_57 = arith.constant 0.000000e+00 : f32
      %109 = vector.broadcast %cst_57 : f32 to vector<1x64xf32>
      %c0_58 = arith.constant 0 : index
      %c0_59 = arith.constant 0 : index
      %110 = vector.load %arg11[%c0_58, %c0_59] : memref<1x64xf32, #tpu.memory_space<vmem>>, vector<1x64xf32>
      tpu.vector_store %arg11[%c0_58, %c0_59], %109 {strides = array<i32>} : memref<1x64xf32, #tpu.memory_space<vmem>>, vector<1x64xf32>,
    } else {
    }
    %c0 = arith.constant 0 : index
    %c0_1 = arith.constant 0 : index
    %c0_2 = arith.constant 0 : index
    %c0_3 = arith.constant 0 : index
    %3 = vector.load %arg2[%c0, %c0_1, %c0_2, %c0_3] : memref<1x1x8x32xf32, #tpu.memory_space<vmem>>, vector<1x1x8x32xf32>
    %4 = vector.shape_cast %3 : vector<1x1x8x32xf32> to vector<8x32xf32>
    %5 = arith.truncf %4 : vector<8x32xf32> to vector<8x32xbf16>
    %c0_4 = arith.constant 0 : index
    %c0_5 = arith.constant 0 : index
    %6 = vector.load %arg3[%c0_4, %c0_5] : memref<32x128xbf16, #tpu.memory_space<vmem>>, vector<32x128xbf16>
    %cst = arith.constant dense<0.000000e+00> : vector<8x128xf32>
    %7 = tpu.matmul %5, %6, %cst {dimension_numbers = #tpu.dot_dimension_numbers<[1], [0], [0], [1], [0, 0, 1, 1], [], []>} : vector<8x32xbf16>, vector<32x128xbf16>, vector<8x128xf32> -> vector<8x128xf32>
    %c0_6 = arith.constant 0 : index
    %c0_7 = arith.constant 0 : index
    %8 = vector.load %arg4[%c0_6, %c0_7] : memref<1x128xf32, #tpu.memory_space<vmem>>, vector<1x128xf32>
    %9 = vector.broadcast %8 : vector<1x128xf32> to vector<8x128xf32>
    %10 = arith.addf %7, %9 : vector<8x128xf32>
    %11 = arith.negf %10 : vector<8x128xf32>
    %12 = math.exp %11 : vector<8x128xf32>
    %cst_8 = arith.constant 1.000000e+00 : f32
    %13 = vector.broadcast %cst_8 : f32 to vector<8x128xf32>
    %14 = arith.addf %13, %12 : vector<8x128xf32>
    %15 = arith.divf %13, %14 : vector<8x128xf32>
    %16 = arith.mulf %10, %15 : vector<8x128xf32>
    %cst_9 = arith.constant 0.000000e+00 : f32
    %17 = vector.broadcast %cst_9 : f32 to vector<8x1280xf32>
    %18 = vector.extract_strided_slice %16 {offsets = [0, 0], sizes = [8, 32], strides = [1, 1]} : vector<8x128xf32> to vector<8x32xf32>
    %19 = arith.truncf %18 : vector<8x32xf32> to vector<8x32xbf16>
    %c0_10 = arith.constant 0 : index
    %c0_11 = arith.constant 0 : index
    %20 = vector.load %arg5[%c0_10, %c0_11] : memref<32x1280xbf16, #tpu.memory_space<vmem>>, vector<32x1280xbf16>
    %cst_12 = arith.constant dense<0.000000e+00> : vector<8x1280xf32>
    %21 = tpu.matmul %19, %20, %cst_12 {dimension_numbers = #tpu.dot_dimension_numbers<[1], [0], [0], [1], [0, 0, 1, 1], [], []>} : vector<8x32xbf16>, vector<32x1280xbf16>, vector<8x1280xf32> -> vector<8x1280xf32>
    %c0_13 = arith.constant 0 : index
    %c0_14 = arith.constant 0 : index
    %22 = vector.load %arg6[%c0_13, %c0_14] : memref<1x1280xf32, #tpu.memory_space<vmem>>, vector<1x1280xf32>
    %23 = vector.broadcast %22 : vector<1x1280xf32> to vector<8x1280xf32>
    %24 = arith.addf %21, %23 : vector<8x1280xf32>
    %25 = arith.negf %24 : vector<8x1280xf32>
    %26 = math.exp %25 : vector<8x1280xf32>
    %cst_15 = arith.constant 1.000000e+00 : f32
    %27 = vector.broadcast %cst_15 : f32 to vector<8x1280xf32>
    %28 = arith.addf %27, %26 : vector<8x1280xf32>
    %29 = arith.divf %27, %28 : vector<8x1280xf32>
    %30 = arith.mulf %24, %29 : vector<8x1280xf32>
    %31 = arith.addf %17, %30 : vector<8x1280xf32>
    %32 = vector.extract_strided_slice %16 {offsets = [0, 32], sizes = [8, 32], strides = [1, 1]} : vector<8x128xf32> to vector<8x32xf32>
    %33 = arith.truncf %32 : vector<8x32xf32> to vector<8x32xbf16>
    %c0_16 = arith.constant 0 : index
    %c0_17 = arith.constant 0 : index
    %34 = vector.load %arg5[%c0_16, %c0_17] : memref<32x1280xbf16, #tpu.memory_space<vmem>>, vector<32x1280xbf16>
    %cst_18 = arith.constant dense<0.000000e+00> : vector<8x1280xf32>
    %35 = tpu.matmul %33, %34, %cst_18 {dimension_numbers = #tpu.dot_dimension_numbers<[1], [0], [0], [1], [0, 0, 1, 1], [], []>} : vector<8x32xbf16>, vector<32x1280xbf16>, vector<8x1280xf32> -> vector<8x1280xf32>
    %c0_19 = arith.constant 0 : index
    %c0_20 = arith.constant 0 : index
    %36 = vector.load %arg6[%c0_19, %c0_20] : memref<1x1280xf32, #tpu.memory_space<vmem>>, vector<1x1280xf32>
    %37 = vector.broadcast %36 : vector<1x1280xf32> to vector<8x1280xf32>
    %38 = arith.addf %35, %37 : vector<8x1280xf32>
    %39 = arith.negf %38 : vector<8x1280xf32>
    %40 = math.exp %39 : vector<8x1280xf32>
    %cst_21 = arith.constant 1.000000e+00 : f32
    %41 = vector.broadcast %cst_21 : f32 to vector<8x1280xf32>
    %42 = arith.addf %41, %40 : vector<8x1280xf32>
    %43 = arith.divf %41, %42 : vector<8x1280xf32>
    %44 = arith.mulf %38, %43 : vector<8x1280xf32>
    %45 = arith.addf %31, %44 : vector<8x1280xf32>
    %46 = vector.extract_strided_slice %16 {offsets = [0, 64], sizes = [8, 32], strides = [1, 1]} : vector<8x128xf32> to vector<8x32xf32>
    %47 = arith.truncf %46 : vector<8x32xf32> to vector<8x32xbf16>
    %c0_22 = arith.constant 0 : index
    %c0_23 = arith.constant 0 : index
    %48 = vector.load %arg5[%c0_22, %c0_23] : memref<32x1280xbf16, #tpu.memory_space<vmem>>, vector<32x1280xbf16>
    %cst_24 = arith.constant dense<0.000000e+00> : vector<8x1280xf32>
    %49 = tpu.matmul %47, %48, %cst_24 {dimension_numbers = #tpu.dot_dimension_numbers<[1], [0], [0], [1], [0, 0, 1, 1], [], []>} : vector<8x32xbf16>, vector<32x1280xbf16>, vector<8x1280xf32> -> vector<8x1280xf32>
    %c0_25 = arith.constant 0 : index
    %c0_26 = arith.constant 0 : index
    %50 = vector.load %arg6[%c0_25, %c0_26] : memref<1x1280xf32, #tpu.memory_space<vmem>>, vector<1x1280xf32>
    %51 = vector.broadcast %50 : vector<1x1280xf32> to vector<8x1280xf32>
    %52 = arith.addf %49, %51 : vector<8x1280xf32>
    %53 = arith.negf %52 : vector<8x1280xf32>
    %54 = math.exp %53 : vector<8x1280xf32>
    %cst_27 = arith.constant 1.000000e+00 : f32
    %55 = vector.broadcast %cst_27 : f32 to vector<8x1280xf32>
    %56 = arith.addf %55, %54 : vector<8x1280xf32>
    %57 = arith.divf %55, %56 : vector<8x1280xf32>
    %58 = arith.mulf %52, %57 : vector<8x1280xf32>
    %59 = arith.addf %45, %58 : vector<8x1280xf32>
    %60 = vector.extract_strided_slice %16 {offsets = [0, 96], sizes = [8, 32], strides = [1, 1]} : vector<8x128xf32> to vector<8x32xf32>
    %61 = arith.truncf %60 : vector<8x32xf32> to vector<8x32xbf16>
    %c0_28 = arith.constant 0 : index
    %c0_29 = arith.constant 0 : index
    %62 = vector.load %arg5[%c0_28, %c0_29] : memref<32x1280xbf16, #tpu.memory_space<vmem>>, vector<32x1280xbf16>
    %cst_30 = arith.constant dense<0.000000e+00> : vector<8x1280xf32>
    %63 = tpu.matmul %61, %62, %cst_30 {dimension_numbers = #tpu.dot_dimension_numbers<[1], [0], [0], [1], [0, 0, 1, 1], [], []>} : vector<8x32xbf16>, vector<32x1280xbf16>, vector<8x1280xf32> -> vector<8x1280xf32>
    %c0_31 = arith.constant 0 : index
    %c0_32 = arith.constant 0 : index
    %64 = vector.load %arg6[%c0_31, %c0_32] : memref<1x1280xf32, #tpu.memory_space<vmem>>, vector<1x1280xf32>
    %65 = vector.broadcast %64 : vector<1x1280xf32> to vector<8x1280xf32>
    %66 = arith.addf %63, %65 : vector<8x1280xf32>
    %67 = arith.negf %66 : vector<8x1280xf32>
    %68 = math.exp %67 : vector<8x1280xf32>
    %cst_33 = arith.constant 1.000000e+00 : f32
    %69 = vector.broadcast %cst_33 : f32 to vector<8x1280xf32>
    %70 = arith.addf %69, %68 : vector<8x1280xf32>
    %71 = arith.divf %69, %70 : vector<8x1280xf32>
    %72 = arith.mulf %66, %71 : vector<8x1280xf32>
    %73 = arith.addf %59, %72 : vector<8x1280xf32>
    %cst_34 = arith.constant 2.500000e-01 : f32
    %74 = vector.broadcast %cst_34 : f32 to vector<8x1280xf32>
    %75 = arith.mulf %73, %74 : vector<8x1280xf32>
    %76 = arith.truncf %75 : vector<8x1280xf32> to vector<8x1280xbf16>
    %c0_35 = arith.constant 0 : index
    %c0_36 = arith.constant 0 : index
    %77 = vector.load %arg7[%c0_35, %c0_36] : memref<1280x128xbf16, #tpu.memory_space<vmem>>, vector<1280x128xbf16>
    %cst_37 = arith.constant dense<0.000000e+00> : vector<8x128xf32>
    %78 = tpu.matmul %76, %77, %cst_37 {dimension_numbers = #tpu.dot_dimension_numbers<[1], [0], [0], [1], [0, 0, 1, 1], [], []>} : vector<8x1280xbf16>, vector<1280x128xbf16>, vector<8x128xf32> -> vector<8x128xf32>
    %c0_38 = arith.constant 0 : index
    %c0_39 = arith.constant 0 : index
    %79 = vector.load %arg8[%c0_38, %c0_39] : memref<1x128xf32, #tpu.memory_space<vmem>>, vector<1x128xf32>
    %80 = vector.broadcast %79 : vector<1x128xf32> to vector<8x128xf32>
    %81 = arith.addf %78, %80 : vector<8x128xf32>
    %82 = arith.negf %81 : vector<8x128xf32>
    %83 = math.exp %82 : vector<8x128xf32>
    %cst_40 = arith.constant 1.000000e+00 : f32
    %84 = vector.broadcast %cst_40 : f32 to vector<8x128xf32>
    %85 = arith.addf %84, %83 : vector<8x128xf32>
    %86 = arith.divf %84, %85 : vector<8x128xf32>
    %87 = vector.extract_strided_slice %86 {offsets = [0, 0], sizes = [8, 64], strides = [1, 1]} : vector<8x128xf32> to vector<8x64xf32>
    %cst_41 = arith.constant 1.000000e-07 : f32
    %cst_42 = arith.constant 0.99999988 : f32
    %88 = vector.broadcast %cst_41 : f32 to vector<8x64xf32>
    %89 = arith.maximumf %88, %87 : vector<8x64xf32>
    %90 = vector.broadcast %cst_42 : f32 to vector<8x64xf32>
    %91 = arith.minimumf %90, %89 : vector<8x64xf32>
    %92 = vector.extract_strided_slice %86 {offsets = [0, 64], sizes = [8, 64], strides = [1, 1]} : vector<8x128xf32> to vector<8x64xf32>
    %c0_43 = arith.constant 0 : index
    %c0_44 = arith.constant 0 : index
    %93 = vector.load %arg10[%c0_43, %c0_44] : memref<1x64xf32, #tpu.memory_space<vmem>>, vector<1x64xf32>
    %cst_45 = arith.constant dense<0.000000e+00> : vector<64xf32>
    %94 = vector.multi_reduction <add>, %91, %cst_45 [0] : vector<8x64xf32> to vector<64xf32>
    %95 = vector.shape_cast %94 : vector<64xf32> to vector<1x64xf32>
    %96 = arith.addf %93, %95 : vector<1x64xf32>
    %c0_46 = arith.constant 0 : index
    %c0_47 = arith.constant 0 : index
    %97 = vector.load %arg10[%c0_46, %c0_47] : memref<1x64xf32, #tpu.memory_space<vmem>>, vector<1x64xf32>
    tpu.vector_store %arg10[%c0_46, %c0_47], %96 {strides = array<i32>} : memref<1x64xf32, #tpu.memory_space<vmem>>, vector<1x64xf32>,
    %c0_48 = arith.constant 0 : index
    %c0_49 = arith.constant 0 : index
    %98 = vector.load %arg11[%c0_48, %c0_49] : memref<1x64xf32, #tpu.memory_space<vmem>>, vector<1x64xf32>
    %99 = arith.mulf %91, %92 : vector<8x64xf32>
    %cst_50 = arith.constant dense<0.000000e+00> : vector<64xf32>
    %100 = vector.multi_reduction <add>, %99, %cst_50 [0] : vector<8x64xf32> to vector<64xf32>
    %101 = vector.shape_cast %100 : vector<64xf32> to vector<1x64xf32>
    %102 = arith.addf %98, %101 : vector<1x64xf32>
    %c0_51 = arith.constant 0 : index
    %c0_52 = arith.constant 0 : index
    %103 = vector.load %arg11[%c0_51, %c0_52] : memref<1x64xf32, #tpu.memory_space<vmem>>, vector<1x64xf32>
    tpu.vector_store %arg11[%c0_51, %c0_52], %102 {strides = array<i32>} : memref<1x64xf32, #tpu.memory_space<vmem>>, vector<1x64xf32>,
    %c1_i32 = arith.constant 1 : i32
    %104 = arith.cmpi eq, %arg1, %c1_i32 : i32
    %105 = arith.extui %104 : i1 to i32
    %c0_i32_53 = arith.constant 0 : i32
    %106 = arith.cmpi ne, %105, %c0_i32_53 : i32
    scf.if %106 {
      %c0_54 = arith.constant 0 : index
      %c0_55 = arith.constant 0 : index
      %107 = vector.load %arg11[%c0_54, %c0_55] : memref<1x64xf32, #tpu.memory_space<vmem>>, vector<1x64xf32>
      %c0_56 = arith.constant 0 : index
      %c0_57 = arith.constant 0 : index
      %108 = vector.load %arg10[%c0_56, %c0_57] : memref<1x64xf32, #tpu.memory_space<vmem>>, vector<1x64xf32>
      %109 = tpu.reciprocal %108 : vector<1x64xf32> -> vector<1x64xf32>
      %110 = arith.mulf %107, %109 : vector<1x64xf32>
      %111 = vector.shape_cast %110 : vector<1x64xf32> to vector<1x1x64xf32>
      %c0_58 = arith.constant 0 : index
      %c0_59 = arith.constant 0 : index
      %c0_60 = arith.constant 0 : index
      %112 = vector.load %arg9[%c0_58, %c0_59, %c0_60] : memref<1x1x64xf32, #tpu.memory_space<vmem>>, vector<1x1x64xf32>
      tpu.vector_store %arg9[%c0_58, %c0_59, %c0_60], %111 {strides = array<i32>} : memref<1x1x64xf32, #tpu.memory_space<vmem>>, vector<1x1x64xf32>,
    } else {
    }
    return
  }
  func.func @transform_0(%arg0: i32, %arg1: i32) -> (i32, i32, i32, i32) {
    %c0_i32 = arith.constant 0 : i32
    %c0_i32_0 = arith.constant 0 : i32
    %c0_i32_1 = arith.constant 0 : i32
    return %arg0, %arg1, %c0_i32, %c0_i32_0 : i32, i32, i32, i32
  }
  func.func @transform_1(%arg0: i32, %arg1: i32) -> (i32, i32) {
    %c0_i32 = arith.constant 0 : i32
    %c0_i32_0 = arith.constant 0 : i32
    %c0_i32_1 = arith.constant 0 : i32
    return %c0_i32, %c0_i32_0 : i32, i32
  }
  func.func @transform_2(%arg0: i32, %arg1: i32) -> (i32, i32) {
    %c0_i32 = arith.constant 0 : i32
    %c0_i32_0 = arith.constant 0 : i32
    %c0_i32_1 = arith.constant 0 : i32
    return %c0_i32, %c0_i32_0 : i32, i32
  }
  func.func @transform_3(%arg0: i32, %arg1: i32) -> (i32, i32) {
    %c0_i32 = arith.constant 0 : i32
    %c0_i32_0 = arith.constant 0 : i32
    %c0_i32_1 = arith.constant 0 : i32
    return %c0_i32, %c0_i32_0 : i32, i32
  }
  func.func @transform_4(%arg0: i32, %arg1: i32) -> (i32, i32) {
    %c0_i32 = arith.constant 0 : i32
    %c0_i32_0 = arith.constant 0 : i32
    %c0_i32_1 = arith.constant 0 : i32
    return %c0_i32, %c0_i32_0 : i32, i32
  }
  func.func @transform_5(%arg0: i32, %arg1: i32) -> (i32, i32) {
    %c0_i32 = arith.constant 0 : i32
    %c0_i32_0 = arith.constant 0 : i32
    %c0_i32_1 = arith.constant 0 : i32
    return %c0_i32, %c0_i32_0 : i32, i32
  }
  func.func @transform_6(%arg0: i32, %arg1: i32) -> (i32, i32) {
    %c0_i32 = arith.constant 0 : i32
    %c0_i32_0 = arith.constant 0 : i32
    %c0_i32_1 = arith.constant 0 : i32
    return %c0_i32, %c0_i32_0 : i32, i32
  }
  func.func @transform_7(%arg0: i32, %arg1: i32) -> (i32, i32, i32) {
    %c0_i32 = arith.constant 0 : i32
    %c0_i32_0 = arith.constant 0 : i32
    %c0_i32_1 = arith.constant 0 : i32
    return %arg0, %c0_i32, %c0_i32_0 : i32, i32, i32
  }
}

</mosaic_0001>

<bundles_post_ra>
// kernel: effnet_attention_forward.1
= control target key start
LH: loop header
LB: loop body
LE: loop exit
PB: predicated region body
PF: predicated region fallthrough
CT: control target
= control target key end

     0   :  { %12 = vsyncpa [#allocation5], 0  ;;  %s3803_s24 = smov 0   ;;  %s3805_s25 = smov 0   ;;  %s5462_s0 = inlined_call_operand.vmem [shape: f32[2,2,8,32], index: 0, kind: input, shape index: {}]   ;;  %s5463_s1 = inlined_call_operand.vmem [shape: bf16[32,128], index: 1, kind: input, shape index: {}]   ;;  %s5464_s2 = inlined_call_operand.vmem [shape: f32[1,128], index: 2, kind: input, shape index: {}]   ;;  %s5465_s3 = inlined_call_operand.vmem [shape: bf16[32,1280], index: 3, kind: input, shape index: {}]   ;;  %s5466_s4 = inlined_call_operand.vmem [shape: f32[1,1280], index: 4, kind: input, shape index: {}]   ;;  %s5467_s5 = inlined_call_operand.hbm [shape: bf16[1280,128], index: 5, kind: input, shape index: {}]   ;;  %s5468_s6 = inlined_call_operand.vmem [shape: f32[1,128], index: 6, kind: input, shape index: {}]   ;;  %s5469_s7 = inlined_call_operand.vmem [shape: f32[2,1,64], index: 7, kind: output, shape index: {}]  }
   0x1   :  { %s3807_s26 = smov 0   ;;  %s3809_s27 = smov 0  }
   0x2   :  { %s3811_s28 = smov 0  }
   0x3 LB: > { %s2847_s29 = sadd.s32 4294967295, %s3754_s28   ;;  %s27_s30 = sadd.s32 1, %s3746_s26  ;;  %s3754_s28 = sphi %s3811_s28, %s18_s28   ;;  %s3750_s27 = sphi %s3809_s27, %s5588_s27   ;;  %s3746_s26 = sphi %s3807_s26, %s5587_s26   ;;  %s3742_s25 = sphi %s3805_s25, %s5586_s25   ;;  %s3738_s24 = sphi %s3803_s24, %s5585_s24  }
   0x4   : > { %p28_p0 = scmp.ge.s32.totalorder %s27_s30, 2  ;;  %s30_s8 = sadd.s32 1, %s3750_s27 }
   0x5   : > { %p2849_p1 = scmp.ge.s32.totalorder %s3754_s28, 1  ;;  %p215_p2 = scmp.lt.s32.totalorder %s3754_s28, 5 }
   0x6   : > { %s5590_s30 = smov (%p28_p0, %s27_s30), 0  ;;  %s5592_s8 = smov (!%p28_p0, %s30_s8), %s3750_s27 }
   0x7   : > { %p3836_p3 = pnand %p2849_p1, %p215_p2  ;;  %p32_p4 = scmp.ge.s32.totalorder %s5592_s8, 2 }
   0x8   : > { %p3840_p5 = scmp.eq.s32.totalorder %s2847_s29, 0  ;;  %s238_s13 = sshll.u32 %s5467_s5, 4  ;;  %s239_s13 = int_to_ptr.hbm [resolvable:$true] %s238_s13 }
   0x9   : > { %p3457_p6 = pneg %p3836_p3  ;;  %s5594_s8 = smov (%p32_p4, %s5592_s8), 0 }
   0xa   : > { %s3756_s14 = smov [#allocation4]   ;;  %s3757_s16 = smov 64  }
   0xb   : > { %s240_s15 = sshll.u32 %s3756_s14, 4  ;;  %p3458_p7 = pnand %p3840_p5, %p3457_p6  ;;  %s241_s15 = int_to_ptr.vmem [resolvable:$true] %s240_s15 }
   0xc   : > { %s3758_s17 = smov 4   ;;  %270 = sbr.rel (%p3836_p3) target bundleno = 927 (0x39f), region = 48 }
   0xd   : > { %3460 = dma.hbm_to_vmem [thread:$0]  (!%p3458_p7), %s239_s13, 10240, %s241_s15, [#allocation5], %s3757_s16, %s3757_s16, %s3758_s17  }
  0x11   : > { %3733 = dma.done.wait (%p3840_p5), [#allocation5], 10240  }
  0x12   : > { %3735 = vsyncadd (%p3840_p5), [#allocation5], 4294957056  ;;  %p304_p8 = scmp.lt.s32.totalorder %s3742_s25, 1  ;;  %p306_p9 = scmp.lt.s32.totalorder %s3738_s24, 1 }
  0x13   : > { %p2856_p10 = scmp.ne.s32.totalorder %s3738_s24, 0 }
  0x14   : > { %s5596_s25 = smov (!%p304_p8, %s3742_s25), 1 }
  0x15   : > { %s307_s18 = scalar_select %p306_p9, %s3738_s24, 1 }
  0x16   : > { %s2854_s19 = sshll.u32 %s5596_s25, 1  ;;  %s314_s22 = scalar_lea.vmem %s5469_s7, %s5596_s25 }
  0x17   : > { %s309_s23 = sadd.s32 %s2854_s19, %s307_s18  ;;  %319 = sbr.rel (%p2856_p10) target bundleno = 31 (0x1f), region = 56 }
  0x18   : > { %s2855_s29 = sshll.u32 %s309_s23, 3 }
  0x19   : > { %s311_s11 = scalar_lea.vmem %s5462_s0, %s2855_s29 }
  0x1c   : > { %vm320_vm0 = vcmask 516096   ;;  %v3759_v0 = vmov 0.0  }
  0x1d   : > { %321 = vst.msk [vmem:[#allocation2] sm:$0x1] %vm320_vm0, %v3759_v0 }
  0x1e   : > { %322 = vst.msk [vmem:[#allocation3] sm:$0x1] %vm320_vm0, %v3759_v0 }
  0x1f PF: > { %v3352_v1 = vld [vmem:[%s5463_s1 + $0x8] sm:$0xff]  ;;  %v3351_v2 = vld [vmem:[%s5463_s1] sm:$0xff]  ;;  %vm345_vm1 = vcmask 261120   ;;  %v2909_v5 = vld [vmem:[%s5465_s3 + $0x50] sm:$0xf]  ;;  %s3760_s19 = smov 32  }
  0x20   : > { %355 = vmatpush.bf16.msra.mxu0 %v3352_v1  ;;  %v323_v3 = vld [vmem:[%s311_s11] sm:$0xff]  ;;  %v3368_v6 = vld [vmem:[%s5465_s3 + $0x74] sm:$0xf0]  ;;  %v3363_v7 = vld [vmem:[%s5465_s3 + $0x54] sm:$0xf]  ;;  %s3761_s20 = smov 96  }
  0x21   : > { %v324_v4 = vpack.c.bf16 %v323_v3, %v323_v3  ;;  %v3890_v8 = vor.u32 %v3368_v6, %v2909_v5  ;;  %v2911_v9 = vld [vmem:[%s5465_s3 + $0x78] sm:$0xf0]  ;;  %v2919_v11 = vld [vmem:[%s5465_s3 + $0x80] sm:$0xf0]  ;;  %v2925_v14 = vld [vmem:[%s5465_s3 + $0x60] sm:$0xf] }
  0x22   : > { %v3364_v10 = vld [vmem:[%s5465_s3 + $0x5c] sm:$0xf]  ;;  %v3901_v12 = vor.u32 %v3363_v7, %v2911_v9  ;;  %v3370_v15 = vld [vmem:[%s5465_s3 + $0x84] sm:$0xf0]  ;;  %v3510_v16 = vld [vmem:[%s5464_s2] ss:$0 sm:$0xff] }
  0x23   : > { %v3903_v13 = vor.u32 %v3364_v10, %v2919_v11  ;;  %536 = vmatpush.bf16.msra.mxu3 %v3890_v8  ;;  %v3915_v17 = vor.u32 %v3370_v15, %v2925_v14  ;;  %v2869_v18 = vld [vmem:[%s5465_s3] sm:$0xf]  ;;  %v3358_v19 = vld [vmem:[%s5465_s3 + $0x24] sm:$0xf0]  ;;  %v3353_v20 = vld [vmem:[%s5465_s3 + $0x4] sm:$0xf] }
  0x24   : > { %356 = vmatpush.bf16.msra.mxu0 %v3351_v2  ;;  %549 = vmatpush.bf16.msra.mxu2 %v3901_v12  ;;  %v3929_v21 = vor.u32 %v3358_v19, %v2869_v18  ;;  %v2871_v22 = vld [vmem:[%s5465_s3 + $0x28] sm:$0xf0]  ;;  %v2879_v24 = vld [vmem:[%s5465_s3 + $0x30] sm:$0xf0]  ;;  %v2885_v27 = vld [vmem:[%s5465_s3 + $0x10] sm:$0xf] }
  0x25   : > { %588 = vmatpush.bf16.msra.mxu1 %v3915_v17  ;;  %v3354_v23 = vld [vmem:[%s5465_s3 + $0xc] sm:$0xf]  ;;  %v3940_v25 = vor.u32 %v3353_v20, %v2871_v22  ;;  %v3360_v28 = vld [vmem:[%s5465_s3 + $0x34] sm:$0xf0]  ;;  %v3369_v36 = vld [vmem:[%s5465_s3 + $0x7c] sm:$0xf0] }
  0x26   : > { %v3942_v26 = vor.u32 %v3354_v23, %v2879_v24  ;;  %v3951_v30 = vor.u32 %v3360_v28, %v2885_v27  ;;  %v2917_v35 = vld [vmem:[%s5465_s3 + $0x58] sm:$0xf]  ;;  %v3365_v37 = vld [vmem:[%s5465_s3 + $0x64] sm:$0xf]  ;;  %v2927_v40 = vld [vmem:[%s5465_s3 + $0x88] sm:$0xf0] }
  0x27   : > { %2865 = vmatmul.msk.bf16.vlgmr.msra.gmra.mxu0 %vm345_vm1, %v324_v4  ;;  %537 = vmatpush.bf16.msra.mxu3 %v3929_v21  ;;  %v3965_v39 = vor.u32 %v3369_v36, %v2917_v35  ;;  %v3366_v41 = vld [vmem:[%s5465_s3 + $0x6c] sm:$0xf]  ;;  %v3973_v42 = vor.u32 %v3365_v37, %v2927_v40  ;;  %v2935_v43 = vld [vmem:[%s5465_s3 + $0x90] sm:$0xf0]  ;;  %v2941_v44 = vld [vmem:[%s5465_s3 + $0x70] sm:$0xf] }
  0x28   : > { %575 = vmatpush.bf16.msrb.mxu0 %v3903_v13  ;;  %550 = vmatpush.bf16.msra.mxu2 %v3940_v25  ;;  %v3372_v45 = vld [vmem:[%s5465_s3 + $0x94] sm:$0xf0]  ;;  %v2877_v46 = vld [vmem:[%s5465_s3 + $0x8] sm:$0xf]  ;;  %v3989_v47 = vor.u32 %v3366_v41, %v2935_v43  ;;  %v3359_v49 = vld [vmem:[%s5465_s3 + $0x2c] sm:$0xf0] }
  0x29   : > { %589 = vmatpush.bf16.msra.mxu1 %v3951_v30  ;;  %v3991_v48 = vor.u32 %v3372_v45, %v2941_v44  ;;  %v3355_v50 = vld [vmem:[%s5465_s3 + $0x14] sm:$0xf]  ;;  %v2887_v51 = vld [vmem:[%s5465_s3 + $0x38] sm:$0xf0]  ;;  %v4002_v52 = vor.u32 %v3359_v49, %v2877_v46  ;;  %v2895_v55 = vld [vmem:[%s5465_s3 + $0x40] sm:$0xf0] }
  0x2a   : > { %v4004_v53 = vor.u32 %v3355_v50, %v2887_v51  ;;  %v3356_v54 = vld [vmem:[%s5465_s3 + $0x1c] sm:$0xf]  ;;  %v2901_v57 = vld [vmem:[%s5465_s3 + $0x20] sm:$0xf]  ;;  %v3362_v58 = vld [vmem:[%s5465_s3 + $0x44] sm:$0xf0] }
  0x2b   : > { %562 = vmatpush.bf16.msrb.mxu3 %v3965_v39  ;;  %v4014_v56 = vor.u32 %v3356_v54, %v2895_v55  ;;  %v4023_v59 = vor.u32 %v3362_v58, %v2901_v57  ;;  %v2933_v6 = vld [vmem:[%s5465_s3 + $0x68] sm:$0xf]  ;;  %v3371_v9 = vld [vmem:[%s5465_s3 + $0x8c] sm:$0xf0]  ;;  %v3367_v10 = vld [vmem:[%s5465_s3 + $0x74] sm:$0xf] }
  0x2c   : > { %576 = vmatpush.bf16.msrb.mxu0 %v3942_v26  ;;  %601 = vmatpush.bf16.msrb.mxu2 %v3973_v42  ;;  %v2943_v11 = vld [vmem:[%s5465_s3 + $0x98] sm:$0xf0]  ;;  %v4040_v15 = vor.u32 %v3371_v9, %v2933_v6  ;;  %v2893_v18 = vld [vmem:[%s5465_s3 + $0x18] sm:$0xf]  ;;  %v3361_v19 = vld [vmem:[%s5465_s3 + $0x3c] sm:$0xf0] }
  0x2d   : > { %640 = vmatpush.bf16.msrb.mxu1 %v3991_v48  ;;  %v3357_v20 = vld [vmem:[%s5465_s3 + $0x24] sm:$0xf]  ;;  %v2903_v22 = vld [vmem:[%s5465_s3 + $0x48] sm:$0xf0]  ;;  %v4062_v23 = vor.u32 %v3361_v19, %v2893_v18  ;;  %s3762_s10 = smov 64   ;;  %p3348_p11 = scmp.ne.s32.totalorder %s3738_s24, 1 }
  0x2e   : > { %v4064_v24 = vor.u32 %v3357_v20, %v2903_v22 }
  0x2f   : > { %563 = vmatpush.bf16.msrb.mxu3 %v4002_v52 }
  0x30   : > { %627 = vmatpush.bf16.msra.mxu0 %v3989_v47  ;;  %602 = vmatpush.bf16.msrb.mxu2 %v4004_v53 }
  0x31   : > { %641 = vmatpush.bf16.msrb.mxu1 %v4023_v59 }
  0x34   : > { %628 = vmatpush.bf16.msra.mxu0 %v4014_v56 }
  0xa4   : > { %v358_v29 = vpop.f32.mrf.mxu0 }
  0xa5   : > { %v359_v31 = vadd.f32 %v3510_v16, %v358_v29  ;;  %v4042_v16 = vor.u32 %v3367_v10, %v2943_v11 }
  0xa7   : > { %v2866_v32 = vmul.f32 -1.442695, %v359_v31 }
  0xa9   : > { %3512 = vpow2.f32 %v2866_v32 }
  0xac   : > { %v360_v33 = vpop.f32.mrf.mxu0 }
  0xaf   : > { %v3513_v34 = vpop.eup %3512 }
  0xb0   : > { %v365_v38 = vadd.f32 1.0, %v3513_v34 }
  0xb2   : > { %3514 = vrcp.f32 %v365_v38  ;;  %v377_v63 = vand.u32 2147483648, %v365_v38  ;;  %v375_v1 = vand.u32 2147483647, %v365_v38  ;;  %vm371_vm3 = vweird.f32 %v365_v38 }
  0xb4   : > { %v378_v3 = vor.u32 1.1754944e-38, %v377_v63  ;;  %vm376_vm5 = vcmp.eq.f32.partialorder %v375_v1, 8.507059e+37 }
  0xb8   : > { %v3515_v60 = vpop.eup %3514 }
  0xb9   : > { %v367_v61 = vmul.f32 %v3515_v60, %v365_v38  ;;  %vm372_vm2 = vweird.f32 %v3515_v60 }
  0xba   : > { %vm373_vm4 = vmor %vm371_vm3, %vm372_vm2 }
  0xbb   : > { %v368_v62 = vsub.f32 1.0, %v367_v61 }
  0xbd   : > { %v369_v0 = vmul.f32 %v3515_v60, %v368_v62  ;;  %v404_v62 = vld [vmem:[%s5466_s4 + $0x8] sm:$0x3] }
  0xbe   : > { %v4277_v22 = vperm.slane %v404_v62, 1 }
  0xbf   : > { %v370_v2 = vadd.f32 %v3515_v60, %v369_v0 }
  0xc1   : > { %v374_v4 = vsel %vm373_vm4, %v3515_v60, %v370_v2 }
  0xc2   : > { %v379_v5 = vsel %vm376_vm5, %v378_v3, %v374_v4  ;;  %v4231_v3 = vperm.slane %v404_v62, 0 }
  0xc3   : > { %v381_v7 = vmul.f32 %v379_v5, %v359_v31 }
  0xc5   : > { %v382_v14 = vpack.c.bf16 %v381_v7, %v381_v7 }
  0xc7   : > { %1561 = vrot.lane.b32.xlu1 %v382_v14, %s3760_s19  ;;  %871 = vrot.lane.b32.xlu0 %v382_v14, %s3761_s20 }
  0xc8   : > { %2947 = vmatmul.msk.bf16.vlgmr.msra.gmra.mxu3 %vm345_vm1, %v382_v14  ;;  %2948 = vmatmul.msk.bf16.vlgmr.msra.gmra.mxu2 %vm345_vm1, %v382_v14 }
  0xc9   : > { %2950 = vmatmul.msk.bf16.vlgmr.msrb.gmra.mxu0 %vm345_vm1, %v382_v14  ;;  %2951 = vmatmul.msk.bf16.vlgmr.msra.gmra.mxu1 %vm345_vm1, %v382_v14 }
  0xca   : > { %614 = vmatpush.bf16.msra.mxu3 %v4040_v15  ;;  %653 = vmatpush.bf16.msra.mxu2 %v4042_v16 }
  0xcb   : > { %895 = vmatpush.bf16.msrb.mxu0 %v3901_v12  ;;  %908 = vmatpush.bf16.msra.mxu1 %v3965_v39 }
  0xce   : > { %615 = vmatpush.bf16.msra.mxu3 %v4062_v23  ;;  %654 = vmatpush.bf16.msra.mxu2 %v4064_v24 }
  0xcf   : > { %1216 = vrot.lane.b32.xlu0 %v382_v14, %s3762_s10  ;;  %896 = vmatpush.bf16.msrb.mxu0 %v3940_v25 }
  0xd0   : > { %909 = vmatpush.bf16.msra.mxu1 %v4002_v52 }
  0xd8   : > { %2949 = vmatmul.msk.bf16.vlgmr.msrb.gmra.mxu3 %vm345_vm1, %v382_v14  ;;  %2952 = vmatmul.msk.bf16.vlgmr.msrb.gmra.mxu2 %vm345_vm1, %v382_v14 }
  0xd9   : > { %2954 = vmatmul.msk.bf16.vlgmr.msra.gmra.mxu0 %vm345_vm1, %v382_v14  ;;  %2955 = vmatmul.msk.bf16.vlgmr.msrb.gmra.mxu1 %vm345_vm1, %v382_v14 }
  0xda   : > { %882 = vmatpush.bf16.msrb.mxu3 %v3890_v8  ;;  %921 = vmatpush.bf16.msrb.mxu2 %v3903_v13 }
  0xdb   : > { %947 = vmatpush.bf16.msra.mxu0 %v3973_v42  ;;  %960 = vmatpush.bf16.msrb.mxu1 %v4040_v15 }
  0xde   : > { %883 = vmatpush.bf16.msrb.mxu3 %v3929_v21  ;;  %922 = vmatpush.bf16.msrb.mxu2 %v3942_v26 }
  0xdf   : > { %948 = vmatpush.bf16.msra.mxu0 %v4004_v53  ;;  %961 = vmatpush.bf16.msrb.mxu1 %v4062_v23 }
  0xe8   : > { %2953 = vmatmul.msk.bf16.vlgmr.msra.gmra.mxu3 %vm345_vm1, %v382_v14  ;;  %2956 = vmatmul.msk.bf16.vlgmr.msra.gmra.mxu2 %vm345_vm1, %v382_v14 }
  0xe9   : > { %934 = vmatpush.bf16.msra.mxu3 %v3915_v17  ;;  %973 = vmatpush.bf16.msra.mxu2 %v3989_v47 }
  0xed   : > { %935 = vmatpush.bf16.msra.mxu3 %v3951_v30  ;;  %974 = vmatpush.bf16.msra.mxu2 %v4014_v56 }
 0x139   : > { %v872_v27 = vpop.permute.xlu0 %871 }
 0x13a   : > { %2967 = vmatmul.msk.bf16.vlgmr.msrb.gmra.mxu3 %vm345_vm1, %v872_v27  ;;  %2968 = vmatmul.msk.bf16.vlgmr.msrb.gmra.mxu0 %vm345_vm1, %v872_v27 }
 0x13b   : > { %2969 = vmatmul.msk.bf16.vlgmr.msra.gmra.mxu1 %vm345_vm1, %v872_v27  ;;  %2970 = vmatmul.msk.bf16.vlgmr.msrb.gmra.mxu2 %vm345_vm1, %v872_v27 }
 0x13c   : > { %986 = vmatpush.bf16.msrb.mxu3 %v3991_v48  ;;  %999 = vmatpush.bf16.msrb.mxu0 %v4042_v16 }
 0x13d   : > { %1227 = vmatpush.bf16.msra.mxu1 %v3890_v8  ;;  %1240 = vmatpush.bf16.msrb.mxu2 %v3901_v12 }
 0x140   : > { %987 = vmatpush.bf16.msrb.mxu3 %v4023_v59  ;;  %1000 = vmatpush.bf16.msrb.mxu0 %v4064_v24 }
 0x141   : > { %1228 = vmatpush.bf16.msra.mxu1 %v3929_v21  ;;  %1241 = vmatpush.bf16.msrb.mxu2 %v3940_v25  ;;  %v1217_v40 = vpop.permute.xlu0 %1216 }
 0x146   : > { %v4103_v28 = vpop.f32.mrf.mxu0  ;;  %v4105_v29 = vpop.f32.mrf.mxu1 }
 0x14a   : > { %2971 = vmatmul.msk.bf16.vlgmr.msra.gmra.mxu3 %vm345_vm1, %v872_v27  ;;  %2972 = vmatmul.msk.bf16.vlgmr.msra.gmra.mxu0 %vm345_vm1, %v872_v27 }
 0x14b   : > { %v4109_v31 = vpop.f32.mrf.mxu3  ;;  %v4111_v32 = vpop.f32.mrf.mxu2  ;;  %2973 = vmatmul.msk.bf16.vlgmr.msrb.gmra.mxu1 %vm345_vm1, %v872_v27  ;;  %2974 = vmatmul.msk.bf16.vlgmr.msra.gmra.mxu2 %vm345_vm1, %v872_v27 }
 0x14c   : > { %1253 = vmatpush.bf16.msra.mxu3 %v3965_v39  ;;  %1266 = vmatpush.bf16.msra.mxu0 %v3903_v13 }
 0x14d   : > { %1279 = vmatpush.bf16.msrb.mxu1 %v3915_v17  ;;  %1292 = vmatpush.bf16.msra.mxu2 %v3973_v42 }
 0x14e   : > { %v580_v33 = vpop.f32.mrf.mxu0  ;;  %v593_v34 = vpop.f32.mrf.mxu1 }
 0x150   : > { %1254 = vmatpush.bf16.msra.mxu3 %v4002_v52  ;;  %1267 = vmatpush.bf16.msra.mxu0 %v3942_v26 }
 0x151   : > { %1280 = vmatpush.bf16.msrb.mxu1 %v3951_v30  ;;  %1293 = vmatpush.bf16.msra.mxu2 %v4004_v53 }
 0x153   : > { %v541_v35 = vpop.f32.mrf.mxu3  ;;  %v554_v36 = vpop.f32.mrf.mxu2 }
 0x156   : > { %v4123_v37 = vpop.f32.mrf.mxu0  ;;  %v4125_v38 = vpop.f32.mrf.mxu1 }
 0x157   : > { %v4248_v9 = vadd.f32 %v4125_v38, %v4231_v3 }
 0x159   : > { %5485 = vst [vmem:[#allocation10_spill] sm:$0xff] %v4248_v9 }
 0x15a   : > { %2975 = vmatmul.msk.bf16.vlgmr.msrb.gmra.mxu3 %vm345_vm1, %v872_v27  ;;  %2976 = vmatmul.msk.bf16.vlgmr.msrb.gmra.mxu0 %vm345_vm1, %v872_v27 }
 0x15b   : > { %v4129_v41 = vpop.f32.mrf.mxu3  ;;  %v4131_v43 = vpop.f32.mrf.mxu2  ;;  %2987 = vmatmul.msk.bf16.vlgmr.msra.gmra.mxu1 %vm345_vm1, %v1217_v40  ;;  %2988 = vmatmul.msk.bf16.vlgmr.msrb.gmra.mxu2 %vm345_vm1, %v1217_v40 }
 0x15c   : > { %1305 = vmatpush.bf16.msrb.mxu3 %v4040_v15  ;;  %1318 = vmatpush.bf16.msrb.mxu0 %v3989_v47 }
 0x15d   : > { %1331 = vmatpush.bf16.msra.mxu1 %v3991_v48  ;;  %1344 = vmatpush.bf16.msrb.mxu2 %v4042_v16 }
 0x15e   : > { %v632_v44 = vpop.f32.mrf.mxu0  ;;  %v645_v45 = vpop.f32.mrf.mxu1 }
 0x160   : > { %1306 = vmatpush.bf16.msrb.mxu3 %v4062_v23  ;;  %1319 = vmatpush.bf16.msrb.mxu0 %v4014_v56 }
 0x161   : > { %1332 = vmatpush.bf16.msra.mxu1 %v4023_v59  ;;  %1345 = vmatpush.bf16.msrb.mxu2 %v4064_v24 }
 0x163   : > { %v567_v46 = vpop.f32.mrf.mxu3  ;;  %v606_v49 = vpop.f32.mrf.mxu2 }
 0x16a   : > { %2989 = vmatmul.msk.bf16.vlgmr.msra.gmra.mxu3 %vm345_vm1, %v1217_v40  ;;  %2990 = vmatmul.msk.bf16.vlgmr.msra.gmra.mxu0 %vm345_vm1, %v1217_v40 }
 0x16b   : > { %v4145_v50 = vpop.f32.mrf.mxu3  ;;  %v4147_v51 = vpop.f32.mrf.mxu2  ;;  %2991 = vmatmul.msk.bf16.vlgmr.msrb.gmra.mxu1 %vm345_vm1, %v1217_v40  ;;  %2992 = vmatmul.msk.bf16.vlgmr.msra.gmra.mxu2 %vm345_vm1, %v1217_v40 }
 0x16c   : > { %1572 = vmatpush.bf16.msra.mxu3 %v3890_v8  ;;  %1585 = vmatpush.bf16.msra.mxu0 %v3901_v12  ;;  %v403_v8 = vld [vmem:[%s5466_s4] sm:$0xff]  ;;  %v4290_v33 = vadd.f32 %v4147_v51, %v4277_v22 }
 0x16d   : > { %1598 = vmatpush.bf16.msrb.mxu1 %v3965_v39  ;;  %1611 = vmatpush.bf16.msra.mxu2 %v3903_v13  ;;  %v4168_v12 = vperm.slane %v403_v8, 3  ;;  %v4172_v13 = vperm.slane %v403_v8, 4  ;;  %v4214_v57 = vperm.slane %v403_v8, 7  ;;  %v4216_v60 = vperm.slane %v403_v8, 2 }
 0x16e   : > { %v4241_v6 = vperm.slane %v403_v8, 5  ;;  %v4251_v11 = vperm.slane %v403_v8, 6  ;;  %5487 = vst [vmem:[#allocation12_spill] sm:$0xff] %v4290_v33 }
 0x16f   : > { %5482 = vst [vmem:[#allocation7_spill] sm:$0xff] %v4214_v57  ;;  %v4235_v4 = vadd.f32 %v4129_v41, %v4216_v60 }
 0x170   : > { %1573 = vmatpush.bf16.msra.mxu3 %v3929_v21  ;;  %1586 = vmatpush.bf16.msra.mxu0 %v3940_v25  ;;  %v4174_v21 = vperm.slane %v403_v8, 0  ;;  %v4176_v25 = vperm.slane %v403_v8, 1  ;;  %5483 = vst [vmem:[#allocation8_spill] sm:$0xff] %v4216_v60  ;;  %v4257_v14 = vadd.f32 %v4131_v43, %v4241_v6  ;;  %v2966_v43 = vmul.f32 -1.442695, %v4290_v33 }
 0x171   : > { %1599 = vmatpush.bf16.msrb.mxu1 %v4002_v52  ;;  %1612 = vmatpush.bf16.msra.mxu2 %v3942_v26  ;;  %v4188_v26 = vadd.f32 %v4105_v29, %v4172_v13  ;;  %5484 = vst [vmem:[#allocation9_spill] sm:$0xff] %v4241_v6  ;;  %v2959_v10 = vmul.f32 -1.442695, %v4235_v4 }
 0x172   : > { %v4192_v39 = vadd.f32 %v4109_v31, %v4174_v21  ;;  %5486 = vst [vmem:[#allocation11_spill] sm:$0xff] %v4251_v11  ;;  %v2962_v20 = vmul.f32 -1.442695, %v4257_v14 }
 0x173   : > { %v619_v54 = vpop.f32.mrf.mxu3  ;;  %v658_v55 = vpop.f32.mrf.mxu2 }
 0x174   : > { %v2957_v52 = vmul.f32 -1.442695, %v4192_v39 }
 0x17a   : > { %2993 = vmatmul.msk.bf16.vlgmr.msrb.gmra.mxu3 %vm345_vm1, %v1217_v40  ;;  %2994 = vmatmul.msk.bf16.vlgmr.msrb.gmra.mxu0 %vm345_vm1, %v1217_v40 }
 0x17b   : > { %2995 = vmatmul.msk.bf16.vlgmr.msra.gmra.mxu1 %vm345_vm1, %v1217_v40  ;;  %2996 = vmatmul.msk.bf16.vlgmr.msrb.gmra.mxu2 %vm345_vm1, %v1217_v40 }
 0x17c   : > { %1624 = vmatpush.bf16.msrb.mxu3 %v3915_v17  ;;  %1637 = vmatpush.bf16.msrb.mxu0 %v3973_v42  ;;  %v4182_v17 = vadd.f32 %v4103_v28, %v4168_v12 }
 0x17d   : > { %1650 = vmatpush.bf16.msra.mxu1 %v4040_v15  ;;  %1663 = vmatpush.bf16.msrb.mxu2 %v3989_v47  ;;  %v2961_v47 = vmul.f32 -1.442695, %v4188_v26  ;;  %v2965_v15 = vmul.f32 -1.442695, %v4248_v9 }
 0x17e   : > { %v2960_v42 = vmul.f32 -1.442695, %v4182_v17 }
 0x180   : > { %1625 = vmatpush.bf16.msrb.mxu3 %v3951_v30  ;;  %1638 = vmatpush.bf16.msrb.mxu0 %v4004_v53  ;;  %v4196_v30 = vadd.f32 %v4111_v32, %v4176_v25  ;;  %3516 = vpow2.f32 %v2960_v42 }
 0x181   : > { %1651 = vmatpush.bf16.msra.mxu1 %v4062_v23  ;;  %1664 = vmatpush.bf16.msrb.mxu2 %v4014_v56  ;;  %v4202_v56 = vpop.permute.xlu1 %1561  ;;  %3518 = vpow2.f32 %v2961_v47 }
 0x182   : > { %v2958_v53 = vmul.f32 -1.442695, %v4196_v30  ;;  %3520 = vpow2.f32 %v2957_v52 }
 0x184   : > { %3522 = vpow2.f32 %v2958_v53 }
 0x186   : > { %v3517_v58 = vpop.eup %3516 }
 0x187   : > { %v3519_v61 = vpop.eup %3518  ;;  %v4223_v1 = vadd.f32 1.0, %v3517_v58 }
 0x188   : > { %v3521_v63 = vpop.eup %3520  ;;  %v4229_v2 = vadd.f32 1.0, %v3519_v61 }
 0x189   : > { %v4237_v5 = vadd.f32 1.0, %v3521_v63  ;;  %3524 = vrcp.f32 %v4223_v1  ;;  %v756_v55 = vand.u32 2147483648, %v4223_v1  ;;  %vm750_vm6 = vweird.f32 %v4223_v1 }
 0x18a   : > { %3007 = vmatmul.msk.bf16.vlgmr.msra.gmra.mxu3 %vm345_vm1, %v4202_v56  ;;  %3008 = vmatmul.msk.bf16.vlgmr.msra.gmra.mxu0 %vm345_vm1, %v4202_v56  ;;  %v3523_v0 = vpop.eup %3522  ;;  %3526 = vrcp.f32 %v4229_v2  ;;  %v754_v47 = vand.u32 2147483647, %v4223_v1  ;;  %v771_v52 = vand.u32 2147483648, %v4229_v2  ;;  %vm765_vm8 = vweird.f32 %v4229_v2 }
 0x18b   : > { %3009 = vmatmul.msk.bf16.vlgmr.msrb.gmra.mxu1 %vm345_vm1, %v4202_v56  ;;  %3010 = vmatmul.msk.bf16.vlgmr.msra.gmra.mxu2 %vm345_vm1, %v4202_v56  ;;  %3528 = vrcp.f32 %v4237_v5  ;;  %v769_v63 = vand.u32 2147483647, %v4229_v2  ;;  %vm705_vm14 = vweird.f32 %v4237_v5 }
 0x18c   : > { %1676 = vmatpush.bf16.msra.mxu3 %v3991_v48  ;;  %1689 = vmatpush.bf16.msra.mxu0 %v4042_v16  ;;  %v4227_v48 = vadd.f32 %v4123_v37, %v4214_v57  ;;  %v4266_v16 = vadd.f32 %v4145_v50, %v4251_v11  ;;  %vm755_vm2 = vcmp.eq.f32.partialorder %v754_v47, 8.507059e+37 }
 0x18d   : > { %vm770_vm3 = vcmp.eq.f32.partialorder %v769_v63, 8.507059e+37 }
 0x18e   : > { %v2964_v7 = vmul.f32 -1.442695, %v4227_v48  ;;  %v2963_v27 = vmul.f32 -1.442695, %v4266_v16 }
 0x18f   : > { %v4272_v18 = vpop.eup %3524 }
 0x190   : > { %1677 = vmatpush.bf16.msra.mxu3 %v4023_v59  ;;  %1690 = vmatpush.bf16.msra.mxu0 %v4064_v24  ;;  %v4239_v59 = vadd.f32 1.0, %v3523_v0  ;;  %v4274_v19 = vpop.eup %3526  ;;  %v746_v31 = vmul.f32 %v4272_v18, %v4223_v1  ;;  %vm751_vm7 = vweird.f32 %v4272_v18  ;;  %v709_v1 = vand.u32 2147483647, %v4237_v5 }
 0x191   : > { %v4279_v23 = vpop.eup %3528  ;;  %v761_v32 = vmul.f32 %v4274_v19, %v4229_v2  ;;  %vm766_vm9 = vweird.f32 %v4274_v19  ;;  %vm4339_vm11 = vmor %vm750_vm6, %vm751_vm7 }
 0x192   : > { %3530 = vrcp.f32 %v4239_v59  ;;  %v701_v34 = vmul.f32 %v4279_v23, %v4237_v5  ;;  %v747_v40 = vsub.f32 1.0, %v746_v31  ;;  %vm706_vm10 = vweird.f32 %v4279_v23  ;;  %vm4348_vm13 = vmor %vm765_vm8, %vm766_vm9 }
 0x193   : > { %3532 = vpow2.f32 %v2964_v7  ;;  %v762_v41 = vsub.f32 1.0, %v761_v32  ;;  %v757_v7 = vor.u32 1.1754944e-38, %v756_v55  ;;  %v726_v32 = vand.u32 2147483648, %v4239_v59  ;;  %vm4364_vm15 = vmor %vm705_vm14, %vm706_vm10 }
 0x194   : > { %3534 = vpow2.f32 %v2959_v10  ;;  %v702_v44 = vsub.f32 1.0, %v701_v34  ;;  %v748_v51 = vmul.f32 %v4272_v18, %v747_v40  ;;  %vm720_vm0 = vweird.f32 %v4239_v59 }
 0x195   : > { %3536 = vpow2.f32 %v2965_v15  ;;  %v763_v54 = vmul.f32 %v4274_v19, %v762_v41  ;;  %vm710_vm4 = vcmp.eq.f32.partialorder %v709_v1, 8.507059e+37 }
 0x196   : > { %3538 = vpow2.f32 %v2962_v20  ;;  %v703_v8 = vmul.f32 %v4279_v23, %v702_v44 }
 0x197   : > { %3540 = vpow2.f32 %v2963_v27  ;;  %v764_v62 = vadd.f32 %v4274_v19, %v763_v54  ;;  %v772_v27 = vor.u32 1.1754944e-38, %v771_v52 }
 0x198   : > { %v4281_v24 = vpop.eup %3530  ;;  %v704_v10 = vadd.f32 %v4279_v23, %v703_v8 }
 0x199   : > { %v3533_v28 = vpop.eup %3532  ;;  %v716_v35 = vmul.f32 %v4281_v24, %v4239_v59  ;;  %vm721_vm12 = vweird.f32 %v4281_v24  ;;  %v768_v2 = vsel %vm4348_vm13, %v4274_v19, %v764_v62 }
 0x19a   : > { %3011 = vmatmul.msk.bf16.vlgmr.msrb.gmra.mxu3 %vm345_vm1, %v4202_v56  ;;  %3012 = vmatmul.msk.bf16.vlgmr.msrb.gmra.mxu0 %vm345_vm1, %v4202_v56  ;;  %v3535_v29 = vpop.eup %3534  ;;  %v4296_v36 = vadd.f32 1.0, %v3533_v28  ;;  %v711_v28 = vand.u32 2147483648, %v4237_v5  ;;  %v724_v5 = vand.u32 2147483647, %v4239_v59 }
 0x19b   : > { %3013 = vmatmul.msk.bf16.vlgmr.msra.gmra.mxu1 %vm345_vm1, %v4202_v56  ;;  %3014 = vmatmul.msk.bf16.vlgmr.msrb.gmra.mxu2 %vm345_vm1, %v4202_v56  ;;  %v4298_v37 = vadd.f32 1.0, %v3535_v29  ;;  %v3537_v38 = vpop.eup %3536  ;;  %v717_v46 = vsub.f32 1.0, %v716_v35 }
 0x19c   : > { %v3539_v45 = vpop.eup %3538  ;;  %3542 = vrcp.f32 %v4296_v36  ;;  %v4302_v49 = vadd.f32 1.0, %v3537_v38  ;;  %v712_v59 = vor.u32 1.1754944e-38, %v711_v28  ;;  %vm725_vm5 = vcmp.eq.f32.partialorder %v724_v5, 8.507059e+37 }
 0x19d   : > { %3544 = vrcp.f32 %v4298_v37  ;;  %v3541_v50 = vpop.eup %3540  ;;  %v4309_v42 = vadd.f32 1.0, %v3539_v45  ;;  %v718_v53 = vmul.f32 %v4281_v24, %v717_v46  ;;  %v773_v46 = vsel %vm770_vm3, %v772_v27, %v768_v2 }
 0x19e   : > { %3546 = vpow2.f32 %v2966_v43  ;;  %v4322_v58 = vadd.f32 1.0, %v3541_v50  ;;  %v727_v50 = vor.u32 1.1754944e-38, %v726_v32  ;;  %v816_v54 = vand.u32 2147483648, %v4296_v36 }
 0x19f   : > { %3548 = vrcp.f32 %v4302_v49  ;;  %v719_v29 = vadd.f32 %v4281_v24, %v718_v53  ;;  %v831_v62 = vand.u32 2147483648, %v4302_v49  ;;  %vm810_vm6 = vweird.f32 %v4296_v36 }
 0x1a0   : > { %3550 = vrcp.f32 %v4309_v42  ;;  %v817_v31 = vor.u32 1.1754944e-38, %v816_v54  ;;  %vm825_vm7 = vweird.f32 %v4302_v49  ;;  %vm735_vm8 = vweird.f32 %v4298_v37 }
 0x1a1   : > { %3552 = vrcp.f32 %v4322_v58  ;;  %v4425_v2 = vor.u32 1.1754944e-38, %v831_v62  ;;  %v741_v40 = vand.u32 2147483648, %v4298_v37 }
 0x1a2   : > { %v4324_v61 = vpop.eup %3542 }
 0x1a3   : > { %v4330_v0 = vpop.eup %3544  ;;  %v806_v19 = vmul.f32 %v4324_v61, %v4296_v36  ;;  %vm811_vm9 = vweird.f32 %v4324_v61  ;;  %v742_v62 = vor.u32 1.1754944e-38, %v741_v40 }
 0x1a4   : > { %v3547_v15 = vpop.eup %3546  ;;  %v731_v41 = vmul.f32 %v4330_v0, %v4298_v37  ;;  %vm4457_vm13 = vmor %vm810_vm6, %vm811_vm9  ;;  %vm795_vm6 = vweird.f32 %v4322_v58 }
 0x1a5   : > { %v4370_v38 = vpop.eup %3548  ;;  %v4383_v43 = vadd.f32 1.0, %v3547_v15  ;;  %v807_v52 = vsub.f32 1.0, %v806_v19  ;;  %v814_v15 = vand.u32 2147483647, %v4296_v36 }
 0x1a6   : > { %v821_v55 = vmul.f32 %v4370_v38, %v4302_v49  ;;  %v732_v53 = vsub.f32 1.0, %v731_v41  ;;  %vm826_vm14 = vweird.f32 %v4370_v38 }
 0x1a7   : > { %3554 = vrcp.f32 %v4383_v43  ;;  %vm4435_vm10 = vcmp.eq.f32.partialorder %v814_v15, 8.507059e+37 }
 0x1a8   : > { %v822_v27 = vsub.f32 1.0, %v821_v55  ;;  %v733_v1 = vmul.f32 %v4330_v0, %v732_v53 }
 0x1aa   : > { %3015 = vmatmul.msk.bf16.vlgmr.msra.gmra.mxu3 %vm345_vm1, %v4202_v56  ;;  %3016 = vmatmul.msk.bf16.vlgmr.msra.gmra.mxu0 %vm345_vm1, %v4202_v56  ;;  %v749_v56 = vadd.f32 %v4272_v18, %v748_v51  ;;  %vm4375_vm1 = vmor %vm720_vm0, %vm721_vm12  ;;  %v823_v41 = vmul.f32 %v4370_v38, %v822_v27  ;;  %vm780_vm12 = vweird.f32 %v4309_v42  ;;  %v786_v27 = vand.u32 2147483648, %v4309_v42 }
 0x1ab   : > { %v723_v44 = vsel %vm4375_vm1, %v4281_v24, %v719_v29 }
 0x1ac   : > { %v753_v34 = vsel %vm4339_vm11, %v4272_v18, %v749_v56  ;;  %v708_v18 = vsel %vm4364_vm15, %v4279_v23, %v704_v10  ;;  %v4388_v23 = vpop.eup %3550  ;;  %v728_v47 = vsel %vm725_vm5, %v727_v50, %v723_v44  ;;  %v4400_v56 = vmul.f32 %v773_v46, %v4188_v26 }
 0x1ad   : > { %v758_v45 = vsel %vm755_vm2, %v757_v7, %v753_v34  ;;  %v713_v51 = vsel %vm710_vm4, %v712_v59, %v708_v18  ;;  %v4393_v8 = vpop.eup %3552  ;;  %v776_v63 = vmul.f32 %v4388_v23, %v4309_v42  ;;  %v4414_v26 = vmul.f32 %v728_v47, %v4196_v30  ;;  %vm4496_vm2 = vmor %vm825_vm7, %vm826_vm14 }
 0x1ae   : > { %v4397_v24 = vmul.f32 %v758_v45, %v4182_v17  ;;  %v4406_v10 = vmul.f32 %v713_v51, %v4192_v39  ;;  %v791_v28 = vmul.f32 %v4393_v8, %v4322_v58  ;;  %v808_v39 = vmul.f32 %v4324_v61, %v807_v52  ;;  %v4428_v5 = vpop.eup %3554 }
 0x1af   : > { %v777_v30 = vsub.f32 1.0, %v776_v63  ;;  %v739_v18 = vand.u32 2147483647, %v4298_v37  ;;  %v734_v46 = vadd.f32 %v4330_v0, %v733_v1  ;;  %vm736_vm11 = vweird.f32 %v4330_v0 }
 0x1b0   : > { %v792_v59 = vsub.f32 1.0, %v791_v28  ;;  %v809_v45 = vadd.f32 %v4324_v61, %v808_v39  ;;  %v836_v55 = vmul.f32 %v4428_v5, %v4383_v43  ;;  %v784_v63 = vand.u32 2147483647, %v4309_v42  ;;  %vm4471_vm15 = vmor %vm735_vm8, %vm736_vm11 }
 0x1b1   : > { %v778_v54 = vmul.f32 %v4388_v23, %v777_v30  ;;  %v738_v30 = vsel %vm4471_vm15, %v4330_v0, %v734_v46  ;;  %vm781_vm0 = vweird.f32 %v4388_v23  ;;  %vm740_vm1 = vcmp.eq.f32.partialorder %v739_v18, 8.507059e+37 }
 0x1b2   : > { %v793_v28 = vmul.f32 %v4393_v8, %v792_v59  ;;  %v837_v40 = vsub.f32 1.0, %v836_v55  ;;  %v799_v59 = vand.u32 2147483647, %v4322_v58  ;;  %vm796_vm3 = vweird.f32 %v4393_v8  ;;  %vm4511_vm4 = vmor %vm780_vm12, %vm781_vm0 }
 0x1b3   : > { %vm4515_vm5 = vcmp.eq.f32.partialorder %v784_v63, 8.507059e+37  ;;  %vm4534_vm7 = vmor %vm795_vm6, %vm796_vm3  ;;  %vm841_vm0 = vweird.f32 %v4428_v5 }
 0x1b4   : > { %v794_v46 = vadd.f32 %v4393_v8, %v793_v28  ;;  %v838_v19 = vmul.f32 %v4428_v5, %v837_v40  ;;  %vm4538_vm8 = vcmp.eq.f32.partialorder %v799_v59, 8.507059e+37 }
 0x1b7   : > { %v898_v7 = vpop.f32.mrf.mxu0 }
 0x1b8   : > { %v4411_v20 = vadd.f32 %v898_v7, %v4176_v25  ;;  %v911_v17 = vpop.f32.mrf.mxu1 }
 0x1b9   : > { %v4419_v29 = vadd.f32 %v911_v17, %v4216_v60  ;;  %v4465_v17 = vadd.f32 %v4370_v38, %v823_v41 }
 0x1ba   : > { %v2978_v32 = vmul.f32 -1.442695, %v4411_v20 }
 0x1bb   : > { %v2979_v35 = vmul.f32 -1.442695, %v4419_v29 }
 0x1bc   : > { %3556 = vpow2.f32 %v2978_v32  ;;  %v813_v32 = vsel %vm4457_vm13, %v4324_v61, %v809_v45  ;;  %v743_v45 = vsel %vm740_vm1, %v742_v62, %v738_v30 }
 0x1bd   : > { %3558 = vpow2.f32 %v2979_v35  ;;  %v885_v44 = vpop.f32.mrf.mxu3  ;;  %v779_v35 = vadd.f32 %v4388_v23, %v778_v54 }
 0x1be   : > { %v4444_v50 = vadd.f32 %v885_v44, %v4174_v21  ;;  %v924_v51 = vpop.f32.mrf.mxu2  ;;  %v801_v44 = vand.u32 2147483648, %v4322_v58 }
 0x1bf   : > { %v4451_v47 = vadd.f32 %v924_v51, %v4168_v12  ;;  %v900_v52 = vpop.f32.mrf.mxu0  ;;  %v4505_v51 = vsel %vm4435_vm10, %v817_v31, %v813_v32  ;;  %v783_v42 = vsel %vm4511_vm4, %v4388_v23, %v779_v35  ;;  %vm840_vm4 = vweird.f32 %v4383_v43 }
 0x1c0   : > { %v2977_v7 = vmul.f32 -1.442695, %v4444_v50  ;;  %v913_v15 = vpop.f32.mrf.mxu1  ;;  %v787_v52 = vor.u32 1.1754944e-38, %v786_v27  ;;  %v802_v23 = vor.u32 1.1754944e-38, %v801_v44 }
 0x1c1   : > { %v2980_v39 = vmul.f32 -1.442695, %v4451_v47 }
 0x1c2   : > { %v3557_v1 = vpop.eup %3556  ;;  %3560 = vpow2.f32 %v2977_v7  ;;  %v4530_v7 = vmul.f32 %v743_v45, %v4235_v4  ;;  %v798_v4 = vsel %vm4534_vm7, %v4393_v8, %v794_v46  ;;  %v4559_v44 = vsel %vm4515_vm5, %v787_v52, %v783_v42 }
 0x1c3   : > { %v3559_v37 = vpop.eup %3558  ;;  %v4486_v41 = vadd.f32 1.0, %v3557_v1  ;;  %3562 = vpow2.f32 %v2980_v39  ;;  %v4562_v8 = vadd.f32 %v4428_v5, %v838_v19 }
 0x1c4   : > { %v4490_v61 = vadd.f32 1.0, %v3559_v37 }
 0x1c5   : > { %3564 = vrcp.f32 %v4486_v41  ;;  %v887_v18 = vpop.f32.mrf.mxu3  ;;  %v1070_v39 = vand.u32 2147483647, %v4486_v41  ;;  %v1072_v1 = vand.u32 2147483648, %v4486_v41  ;;  %vm1066_vm9 = vweird.f32 %v4486_v41 }
 0x1c6   : > { %3566 = vrcp.f32 %v4490_v61  ;;  %v926_v53 = vpop.f32.mrf.mxu2  ;;  %v1085_v30 = vand.u32 2147483647, %v4490_v61  ;;  %v1087_v37 = vand.u32 2147483648, %v4490_v61  ;;  %v4570_v18 = vsel %vm4538_vm8, %v802_v23, %v798_v4 }
 0x1c7   : > { %v950_v62 = vpop.f32.mrf.mxu0  ;;  %vm4575_vm10 = vcmp.eq.f32.partialorder %v1070_v39, 8.507059e+37  ;;  %v1073_v52 = vor.u32 1.1754944e-38, %v1072_v1  ;;  %vm1081_vm11 = vweird.f32 %v4490_v61 }
 0x1c8   : > { %v3561_v63 = vpop.eup %3560  ;;  %v4543_v58 = vadd.f32 %v950_v62, %v4241_v6  ;;  %v963_v27 = vpop.f32.mrf.mxu1  ;;  %vm4581_vm12 = vcmp.eq.f32.partialorder %v1085_v30, 8.507059e+37 }
 0x1c9   : > { %v3563_v28 = vpop.eup %3562  ;;  %v4550_v32 = vadd.f32 1.0, %v3561_v63  ;;  %v4566_v45 = vadd.f32 %v963_v27, %v4251_v11  ;;  %v1088_v63 = vor.u32 1.1754944e-38, %v1087_v37 }
 0x1ca   : > { %v4554_v35 = vadd.f32 1.0, %v3563_v28  ;;  %v2982_v40 = vmul.f32 -1.442695, %v4543_v58 }
 0x1cb   : > { %v3565_v59 = vpop.eup %3564  ;;  %3568 = vrcp.f32 %v4550_v32  ;;  %v2983_v23 = vmul.f32 -1.442695, %v4566_v45  ;;  %vm1051_vm14 = vweird.f32 %v4550_v32  ;;  %v1055_v1 = vand.u32 2147483647, %v4550_v32 }
 0x1cc   : > { %v3567_v46 = vpop.eup %3566  ;;  %v1062_v54 = vmul.f32 %v3565_v59, %v4486_v41  ;;  %3570 = vrcp.f32 %v4554_v35  ;;  %vm1067_vm13 = vweird.f32 %v3565_v59  ;;  %v1057_v30 = vand.u32 2147483648, %v4550_v32 }
 0x1cd   : > { %v1077_v53 = vmul.f32 %v3567_v46, %v4490_v61  ;;  %v937_v42 = vpop.f32.mrf.mxu3  ;;  %3572 = vpow2.f32 %v2982_v40  ;;  %vm1082_vm15 = vweird.f32 %v3567_v46  ;;  %vm1096_vm1 = vweird.f32 %v4554_v35  ;;  %vm1068_vm3 = vmor %vm1066_vm9, %vm1067_vm13 }
 0x1ce   : > { %v1063_v19 = vsub.f32 1.0, %v1062_v54  ;;  %v976_v15 = vpop.f32.mrf.mxu2  ;;  %v4587_v27 = vadd.f32 %v937_v42, %v4172_v13  ;;  %3574 = vpow2.f32 %v2983_v23  ;;  %v1100_v23 = vand.u32 2147483647, %v4554_v35  ;;  %vm1083_vm5 = vmor %vm1081_vm11, %vm1082_vm15 }
 0x1cf   : > { %v1078_v36 = vsub.f32 1.0, %v1077_v53  ;;  %v4590_v28 = vadd.f32 %v976_v15, %v4214_v57  ;;  %v952_v4 = vpop.f32.mrf.mxu0  ;;  %v1102_v11 = vand.u32 2147483648, %v4554_v35  ;;  %vm1056_vm8 = vcmp.eq.f32.partialorder %v1055_v1, 8.507059e+37 }
 0x1d0   : > { %v1064_v39 = vmul.f32 %v3565_v59, %v1063_v19  ;;  %v965_v37 = vpop.f32.mrf.mxu1  ;;  %v2981_v53 = vmul.f32 -1.442695, %v4587_v27 }
 0x1d1   : > { %v3569_v40 = vpop.eup %3568  ;;  %v1079_v54 = vmul.f32 %v3567_v46, %v1078_v36  ;;  %v2984_v4 = vmul.f32 -1.442695, %v4590_v28 }
 0x1d2   : > { %v3571_v42 = vpop.eup %3570  ;;  %v1065_v15 = vadd.f32 %v3565_v59, %v1064_v39  ;;  %v1047_v19 = vmul.f32 %v3569_v40, %v4550_v32  ;;  %3576 = vpow2.f32 %v2981_v53  ;;  %vm1052_vm6 = vweird.f32 %v3569_v40 }
 0x1d3   : > { %v1080_v37 = vadd.f32 %v3567_v46, %v1079_v54  ;;  %v1092_v36 = vmul.f32 %v3571_v42, %v4554_v35  ;;  %v3573_v31 = vpop.eup %3572  ;;  %3578 = vpow2.f32 %v2984_v4  ;;  %vm1097_vm7 = vweird.f32 %v3571_v42  ;;  %vm1053_vm9 = vmor %vm1051_vm14, %vm1052_vm6 }
 0x1d4   : > { %v1069_v39 = vsel %vm1068_vm3, %v3565_v59, %v1065_v15  ;;  %v1048_v34 = vsub.f32 1.0, %v1047_v19  ;;  %v4612_v57 = vadd.f32 1.0, %v3573_v31  ;;  %v3575_v19 = vpop.eup %3574  ;;  %vm1098_vm11 = vmor %vm1096_vm1, %vm1097_vm7  ;;  %v844_v32 = vand.u32 2147483647, %v4383_v43 }
 0x1d5   : > { %v1074_v41 = vsel %vm4575_vm10, %v1073_v52, %v1069_v39  ;;  %v1084_v54 = vsel %vm1083_vm5, %v3567_v46, %v1080_v37  ;;  %v1093_v9 = vsub.f32 1.0, %v1092_v36  ;;  %v939_v53 = vpop.f32.mrf.mxu3  ;;  %vm1101_vm10 = vcmp.eq.f32.partialorder %v1100_v23, 8.507059e+37 }
 0x1d6   : > { %v1197_v6 = vmul.f32 %v1074_v41, %v4411_v20  ;;  %v1089_v59 = vsel %vm4581_vm12, %v1088_v63, %v1084_v54  ;;  %v1049_v15 = vmul.f32 %v3569_v40, %v1048_v34  ;;  %v978_v61 = vpop.f32.mrf.mxu2  ;;  %3580 = vrcp.f32 %v4612_v57  ;;  %vm4651_vm12 = vmor %vm840_vm4, %vm841_vm0 }
 0x1d7   : > { %v1198_v60 = vmul.f32 %v1089_v59, %v4419_v29  ;;  %v1094_v33 = vmul.f32 %v3571_v42, %v1093_v9  ;;  %v1002_v46 = vpop.f32.mrf.mxu0  ;;  %v1058_v20 = vor.u32 1.1754944e-38, %v1057_v30  ;;  %v4628_v29 = vadd.f32 1.0, %v3575_v19 }
 0x1d8   : > { %v4620_v31 = vadd.f32 %v1197_v6, %v4414_v26  ;;  %v1050_v55 = vadd.f32 %v3569_v40, %v1049_v15  ;;  %v1230_v52 = vpop.f32.mrf.mxu1  ;;  %v3577_v62 = vpop.eup %3576  ;;  %v1103_v6 = vor.u32 1.1754944e-38, %v1102_v11  ;;  %v1130_v26 = vand.u32 2147483647, %v4612_v57 }
 0x1d9   : > { %v4623_v34 = vadd.f32 %v1198_v60, %v4530_v7  ;;  %v1095_v9 = vadd.f32 %v3571_v42, %v1094_v33  ;;  %v4634_v1 = vadd.f32 1.0, %v3577_v62  ;;  %v1132_v30 = vand.u32 2147483648, %v4612_v57  ;;  %v3579_v33 = vpop.eup %3578 }
 0x1da   : > { %v1054_v63 = vsel %vm1053_vm9, %v3569_v40, %v1050_v55  ;;  %3582 = vrcp.f32 %v4628_v29  ;;  %v4641_v35 = vadd.f32 %v1002_v46, %v4277_v22  ;;  %v4645_v37 = vmul.f32 %v4559_v44, %v4257_v14 }
 0x1db   : > { %v1059_v60 = vsel %vm1056_vm8, %v1058_v20, %v1054_v63  ;;  %v1099_v7 = vsel %vm1098_vm11, %v3571_v42, %v1095_v9  ;;  %v846_v36 = vand.u32 2147483648, %v4383_v43  ;;  %3584 = vrcp.f32 %v4634_v1 }
 0x1dc   : > { %v1196_v40 = vmul.f32 %v1059_v60, %v4444_v50  ;;  %v1104_v4 = vsel %vm1101_vm10, %v1103_v6, %v1099_v7  ;;  %v3581_v11 = vpop.eup %3580  ;;  %v4660_v39 = vmul.f32 %v4570_v18, %v4266_v16  ;;  %v843_v14 = vsel %vm4651_vm12, %v4428_v5, %v4562_v8  ;;  %v3396_v8 = vld [vmem:[#allocation4 + $0xb8] sm:$0xff] }
 0x1dd   : > { %v1199_v50 = vmul.f32 %v1104_v4, %v4451_v47  ;;  %v989_v23 = vpop.f32.mrf.mxu3  ;;  %v1122_v41 = vmul.f32 %v3581_v11, %v4612_v57  ;;  %vm1126_vm13 = vweird.f32 %v4612_v57  ;;  %vm4674_vm14 = vcmp.eq.f32.partialorder %v1130_v26, 8.507059e+37  ;;  %2596 = vmatpush.bf16.msrb.mxu3 %v3396_v8 }
 0x1de   : > { %v4667_v44 = vadd.f32 %v1196_v40, %v4406_v10  ;;  %v1243_v54 = vpop.f32.mrf.mxu2  ;;  %v1133_v16 = vor.u32 1.1754944e-38, %v1132_v30  ;;  %v1145_v15 = vand.u32 2147483647, %v4628_v29  ;;  %v4679_v61 = vadd.f32 1.0, %v3579_v33  ;;  %v3388_v33 = vld [vmem:[#allocation4 + $0x78] sm:$0xff] }
 0x1df   : > { %v4671_v47 = vadd.f32 %v1199_v50, %v4397_v24  ;;  %v1004_v18 = vpop.f32.mrf.mxu0  ;;  %v1123_v59 = vsub.f32 1.0, %v1122_v41  ;;  %v2986_v10 = vmul.f32 -1.442695, %v4641_v35  ;;  %vm1141_vm15 = vweird.f32 %v4628_v29  ;;  %2583 = vmatpush.bf16.msra.mxu2 %v3388_v33 }
 0x1e0   : > { %v1232_v19 = vpop.f32.mrf.mxu1  ;;  %v3583_v46 = vpop.eup %3582  ;;  %v1147_v24 = vand.u32 2147483648, %v4628_v29  ;;  %v4685_v55 = vadd.f32 %v1230_v52, %v4174_v21  ;;  %v4688_v20 = vadd.f32 %v989_v23, %v4231_v3  ;;  %vm1127_vm0 = vweird.f32 %v3581_v11 }
 0x1e1   : > { %v1124_v62 = vmul.f32 %v3581_v11, %v1123_v59  ;;  %v1137_v9 = vmul.f32 %v3583_v46, %v4628_v29  ;;  %3586 = vrcp.f32 %v4679_v61  ;;  %v3585_v63 = vpop.eup %3584  ;;  %vm1111_vm1 = vweird.f32 %v4634_v1  ;;  %vm1128_vm4 = vmor %vm1126_vm13, %vm1127_vm0  ;;  %v3380_v29 = vld [vmem:[#allocation4 + $0x38] sm:$0xff] }
 0x1e2   : > { %v1115_v6 = vand.u32 2147483647, %v4634_v1  ;;  %3588 = vpow2.f32 %v2986_v10  ;;  %v4695_v26 = vadd.f32 %v1243_v54, %v4176_v25  ;;  %vm4697_vm3 = vcmp.eq.f32.partialorder %v1145_v15, 8.507059e+37  ;;  %2570 = vmatpush.bf16.msrb.mxu1 %v3380_v29 }
 0x1e3   : > { %v1125_v52 = vadd.f32 %v3581_v11, %v1124_v62  ;;  %v1138_v60 = vsub.f32 1.0, %v1137_v9  ;;  %v1107_v30 = vmul.f32 %v3585_v63, %v4634_v1  ;;  %v1148_v40 = vor.u32 1.1754944e-38, %v1147_v24 }
 0x1e4   : > { %v1117_v4 = vand.u32 2147483648, %v4634_v1  ;;  %v2997_v50 = vmul.f32 -1.442695, %v4685_v55  ;;  %v2985_v23 = vmul.f32 -1.442695, %v4688_v20  ;;  %vm1142_vm5 = vweird.f32 %v3583_v46 }
 0x1e5   : > { %v991_v41 = vpop.f32.mrf.mxu3  ;;  %v1129_v54 = vsel %vm1128_vm4, %v3581_v11, %v1125_v52  ;;  %v1139_v18 = vmul.f32 %v3583_v46, %v1138_v60  ;;  %v1108_v59 = vsub.f32 1.0, %v1107_v30  ;;  %vm1112_vm6 = vweird.f32 %v3585_v63  ;;  %v3387_v30 = vld [vmem:[#allocation4 + $0x70] sm:$0xff]  ;;  %vm1143_vm8 = vmor %vm1141_vm15, %vm1142_vm5 }
 0x1e6   : > { %v1245_v15 = vpop.f32.mrf.mxu2  ;;  %v1134_v10 = vsel %vm4674_vm14, %v1133_v16, %v1129_v54  ;;  %3590 = vpow2.f32 %v2997_v50  ;;  %v2998_v57 = vmul.f32 -1.442695, %v4695_v26  ;;  %vm4712_vm7 = vcmp.eq.f32.partialorder %v844_v32, 8.507059e+37  ;;  %2584 = vmatpush.bf16.msra.mxu2 %v3387_v30  ;;  %vm1113_vm10 = vmor %vm1111_vm1, %vm1112_vm6 }
 0x1e7   : > { %v1269_v19 = vpop.f32.mrf.mxu0  ;;  %v4710_v24 = vpop.eup %3586  ;;  %v1201_v11 = vmul.f32 %v1134_v10, %v4543_v58  ;;  %v1140_v9 = vadd.f32 %v3583_v46, %v1139_v18  ;;  %v1109_v52 = vmul.f32 %v3585_v63, %v1108_v59  ;;  %3592 = vpow2.f32 %v2985_v23 }
 0x1e8   : > { %v1282_v60 = vpop.f32.mrf.mxu1  ;;  %v3589_v53 = vpop.eup %3588  ;;  %vm4720_vm9 = vcmp.eq.f32.partialorder %v1115_v6, 8.507059e+37  ;;  %v1118_v32 = vor.u32 1.1754944e-38, %v1117_v4  ;;  %v1152_v33 = vmul.f32 %v4710_v24, %v4679_v61  ;;  %v4727_v58 = vadd.f32 %v1269_v19, %v4168_v12 }
 0x1e9   : > { %v4730_v50 = vadd.f32 %v1201_v11, %v4645_v37  ;;  %v1144_v23 = vsel %vm1143_vm8, %v3583_v46, %v1140_v9  ;;  %v1110_v41 = vadd.f32 %v3585_v63, %v1109_v52  ;;  %v4732_v54 = vadd.f32 1.0, %v3589_v53 }
 0x1ea   : > { %v1149_v6 = vsel %vm4697_vm3, %v1148_v40, %v1144_v23  ;;  %v1153_v4 = vsub.f32 1.0, %v1152_v33  ;;  %3594 = vpow2.f32 %v2998_v57  ;;  %v3000_v18 = vmul.f32 -1.442695, %v4727_v58  ;;  %v3386_v57 = vld [vmem:[#allocation4 + $0x68] sm:$0xff]  ;;  %v3385_v23 = vld [vmem:[#allocation4 + $0x60] sm:$0xff] }
 0x1eb   : > { %v1202_v37 = vmul.f32 %v1149_v6, %v4566_v45  ;;  %v1114_v59 = vsel %vm1113_vm10, %v3585_v63, %v1110_v41  ;;  %v1162_v46 = vand.u32 2147483648, %v4679_v61  ;;  %3596 = vrcp.f32 %v4732_v54  ;;  %2585 = vmatpush.bf16.msra.mxu2 %v3386_v57 }
 0x1ec   : > { %v3591_v15 = vpop.eup %3590  ;;  %v1119_v7 = vsel %vm4720_vm9, %v1118_v32, %v1114_v59  ;;  %v1154_v40 = vmul.f32 %v4710_v24, %v1153_v4  ;;  %vm1157_vm11 = vweird.f32 %v4710_v24  ;;  %v1160_v1 = vand.u32 2147483647, %v4679_v61 }
 0x1ed   : > { %v1256_v10 = vpop.f32.mrf.mxu3  ;;  %v3593_v19 = vpop.eup %3592  ;;  %v4749_v45 = vadd.f32 %v1202_v37, %v4660_v39  ;;  %v1200_v63 = vmul.f32 %v1119_v7, %v4587_v27  ;;  %v4752_v11 = vadd.f32 1.0, %v3591_v15  ;;  %3598 = vpow2.f32 %v3000_v18  ;;  %v3379_v39 = vld [vmem:[#allocation4 + $0x30] sm:$0xff]  ;;  %v5528_v37 = vld [vmem:[#allocation12_spill] sm:$0xff] }
 0x1ee   : > { %v4754_v9 = vpop.f32.mrf.mxu2  ;;  %v847_v52 = vor.u32 1.1754944e-38, %v846_v36  ;;  %v1155_v30 = vadd.f32 %v4710_v24, %v1154_v40  ;;  %vm1156_vm13 = vweird.f32 %v4679_v61  ;;  %v4760_v53 = vadd.f32 1.0, %v3593_v19  ;;  %2571 = vmatpush.bf16.msrb.mxu1 %v3379_v39 }
 0x1ef   : > { %v1271_v16 = vpop.f32.mrf.mxu0  ;;  %v4763_v32 = vadd.f32 %v1200_v63, %v4400_v56  ;;  %vm1158_vm14 = vmor %vm1156_vm13, %vm1157_vm11  ;;  %v1163_v27 = vor.u32 1.1754944e-38, %v1162_v46  ;;  %v1190_v33 = vand.u32 2147483647, %v4732_v54  ;;  %3600 = vrcp.f32 %v4752_v11  ;;  %2586 = vmatpush.bf16.msra.mxu2 %v3385_v23  ;;  %v3384_v46 = vld [vmem:[#allocation4 + $0x58] sm:$0xff]  ;;  %v3395_v63 = vld [vmem:[#allocation4 + $0xb0] sm:$0xff] }
 0x1f0   : > { %v1284_v43 = vpop.f32.mrf.mxu1  ;;  %v3595_v36 = vpop.eup %3594  ;;  %v848_v61 = vsel %vm4712_vm7, %v847_v52, %v843_v14  ;;  %v1159_v56 = vsel %vm1158_vm14, %v4710_v24, %v1155_v30  ;;  %vm1161_vm15 = vcmp.eq.f32.partialorder %v1160_v1, 8.507059e+37  ;;  %3602 = vrcp.f32 %v4760_v53  ;;  %v5531_v1 = vld [vmem:[#allocation8_spill] sm:$0xff]  ;;  %2597 = vmatpush.bf16.msrb.mxu3 %v3395_v63 }
 0x1f1   : > { %v4778_v41 = vpop.eup %3596  ;;  %v5526_v29 = vand.u32 2147483647, %v4302_v49  ;;  %v1164_v6 = vsel %vm1161_vm15, %v1163_v27, %v1159_v56  ;;  %v1192_v42 = vand.u32 2147483648, %v4732_v54  ;;  %v4784_v5 = vadd.f32 %v1282_v60, %v4172_v13  ;;  %v3378_v60 = vld [vmem:[#allocation4 + $0x28] sm:$0xff]  ;;  %v3377_v43 = vld [vmem:[#allocation4 + $0x20] sm:$0xff] }
 0x1f2   : > { %v857_v14 = vmul.f32 %v4505_v51, %v4227_v48  ;;  %v5527_v24 = vsel %vm4496_vm2, %v4370_v38, %v4465_v17  ;;  %v1203_v49 = vmul.f32 %v1164_v6, %v4590_v28  ;;  %v1182_v4 = vmul.f32 %v4778_v41, %v4732_v54  ;;  %2572 = vmatpush.bf16.msrb.mxu1 %v3378_v60  ;;  %v3403_v48 = vld [vmem:[#allocation4 + $0xf0] sm:$0xff] }
 0x1f3   : > { %vm830_vm0 = vcmp.eq.f32.partialorder %v5526_v29, 8.507059e+37  ;;  %v3599_v18 = vpop.eup %3598  ;;  %v4800_v59 = vmul.f32 %v848_v61, %v5528_v37  ;;  %vm1186_vm12 = vweird.f32 %v4732_v54  ;;  %vm4803_vm1 = vcmp.eq.f32.partialorder %v1190_v33, 8.507059e+37  ;;  %2587 = vmatpush.bf16.msra.mxu2 %v3384_v46  ;;  %v3404_v29 = vld [vmem:[#allocation4 + $0xf8] sm:$0xff]  ;;  %v3394_v54 = vld [vmem:[#allocation4 + $0xa8] sm:$0xff] }
 0x1f4   : > { %v4794_v62 = vsel %vm830_vm0, %v4425_v2, %v5527_v24  ;;  %v4807_v38 = vadd.f32 1.0, %v3595_v36  ;;  %v4809_v2 = vadd.f32 %v1203_v49, %v857_v14  ;;  %v1183_v17 = vsub.f32 1.0, %v1182_v4  ;;  %v3383_v14 = vld [vmem:[#allocation4 + $0x50] sm:$0xff]  ;;  %2609 = vmatpush.bf16.msrb.mxu0 %v3404_v29  ;;  %2598 = vmatpush.bf16.msrb.mxu3 %v3394_v54 }
 0x1f5   : > { %v1400_v0 = vand.u32 2147483647, %v4752_v11  ;;  %v4812_v51 = vadd.f32 1.0, %v3599_v18  ;;  %v1258_v28 = vpop.f32.mrf.mxu3  ;;  %v4814_v15 = vpop.eup %3600  ;;  %v1193_v7 = vor.u32 1.1754944e-38, %v1192_v42  ;;  %v3001_v40 = vmul.f32 -1.442695, %v4784_v5 }
 0x1f6   : > { %3604 = vrcp.f32 %v4807_v38  ;;  %v4819_v57 = vadd.f32 %v1256_v10, %v5531_v1  ;;  %v1297_v19 = vpop.f32.mrf.mxu2  ;;  %v4821_v52 = vpop.eup %3602  ;;  %v1184_v30 = vmul.f32 %v4778_v41, %v1183_v17  ;;  %vm1187_vm2 = vweird.f32 %v4778_v41  ;;  %2573 = vmatpush.bf16.msrb.mxu1 %v3377_v43  ;;  %v5534_v4 = vld [vmem:[#allocation9_spill] sm:$0xff] }
 0x1f7   : > { %v1392_v16 = vmul.f32 %v4814_v15, %v4752_v11  ;;  %3606 = vrcp.f32 %v4812_v51  ;;  %v1321_v39 = vpop.f32.mrf.mxu0  ;;  %vm1396_vm3 = vweird.f32 %v4752_v11  ;;  %v1402_v10 = vand.u32 2147483648, %v4752_v11  ;;  %vm1188_vm6 = vmor %vm1186_vm12, %vm1187_vm2  ;;  %2588 = vmatpush.bf16.msra.mxu2 %v3383_v14 }
 0x1f8   : > { %v1167_v27 = vmul.f32 %v4821_v52, %v4760_v53  ;;  %vm1171_vm4 = vweird.f32 %v4760_v53  ;;  %v4833_v33 = vpop.f32.mrf.mxu1  ;;  %v1185_v36 = vadd.f32 %v4778_v41, %v1184_v30  ;;  %vm4836_vm5 = vcmp.eq.f32.partialorder %v1400_v0, 8.507059e+37  ;;  %2610 = vmatpush.bf16.msrb.mxu0 %v3403_v48  ;;  %v3381_v48 = vld [vmem:[#allocation4 + $0x40] sm:$0xff] }
 0x1f9   : > { %v1393_v61 = vsub.f32 1.0, %v1392_v16  ;;  %v1175_v23 = vand.u32 2147483647, %v4760_v53  ;;  %v1177_v42 = vand.u32 2147483648, %v4760_v53  ;;  %3608 = vpow2.f32 %v3001_v40 }
 0x1fa   : > { %v1168_v6 = vsub.f32 1.0, %v1167_v27  ;;  %v2999_v8 = vmul.f32 -1.442695, %v4819_v57  ;;  %v1189_v24 = vsel %vm1188_vm6, %v4778_v41, %v1185_v36  ;;  %vm1397_vm7 = vweird.f32 %v4814_v15  ;;  %v3376_v41 = vld [vmem:[#allocation4 + $0x18] sm:$0xff]  ;;  %v5540_v36 = vld [vmem:[#allocation7_spill] sm:$0xff] }
 0x1fb   : > { %v1394_v49 = vmul.f32 %v4814_v15, %v1393_v61  ;;  %v4852_v60 = vadd.f32 %v4754_v9, %v5534_v4  ;;  %v1194_v37 = vsel %vm4803_vm1, %v1193_v7, %v1189_v24  ;;  %vm1172_vm8 = vweird.f32 %v4821_v52  ;;  %vm4872_vm9 = vmor %vm1396_vm3, %vm1397_vm7  ;;  %2574 = vmatpush.bf16.msrb.mxu1 %v3376_v41 }
 0x1fc   : > { %v4854_v18 = vpop.eup %3604  ;;  %v1169_v17 = vmul.f32 %v4821_v52, %v1168_v6  ;;  %3610 = vpow2.f32 %v2999_v8  ;;  %v1205_v28 = vmul.f32 %v1194_v37, %v4641_v35  ;;  %v1403_v46 = vor.u32 1.1754944e-38, %v1402_v10  ;;  %vm1173_vm11 = vmor %vm1171_vm4, %vm1172_vm8 }
 0x1fd   : > { %v4860_v0 = vpop.eup %3606  ;;  %v1395_v9 = vadd.f32 %v4814_v15, %v1394_v49  ;;  %v1407_v40 = vmul.f32 %v4854_v18, %v4807_v38  ;;  %v4866_v19 = vpop.f32.mrf.mxu3  ;;  %vm4877_vm10 = vcmp.eq.f32.partialorder %v1175_v23, 8.507059e+37  ;;  %v1178_v30 = vor.u32 1.1754944e-38, %v1177_v42  ;;  %v5541_v49 = vld [vmem:[#allocation10_spill] sm:$0xff] }
 0x1fe   : > { %v1170_v35 = vadd.f32 %v4821_v52, %v1169_v17  ;;  %v3002_v16 = vmul.f32 -1.442695, %v4852_v60  ;;  %v4882_v10 = vpop.f32.mrf.mxu2  ;;  %v4885_v27 = vadd.f32 %v1205_v28, %v4800_v59  ;;  %v1437_v43 = vmul.f32 %v4860_v0, %v4812_v51  ;;  %v3393_v17 = vld [vmem:[#allocation4 + $0xa0] sm:$0xff]  ;;  %v3375_v28 = vld [vmem:[#allocation4 + $0x10] sm:$0xff] }
 0x1ff   : > { %v1399_v11 = vsel %vm4872_vm9, %v4814_v15, %v1395_v9  ;;  %v4897_v61 = vadd.f32 %v1321_v39, %v5540_v36  ;;  %v1323_v23 = vpop.f32.mrf.mxu0  ;;  %v3609_v29 = vpop.eup %3608  ;;  %v1408_v15 = vsub.f32 1.0, %v1407_v40  ;;  %v3382_v39 = vld [vmem:[#allocation4 + $0x48] sm:$0xff]  ;;  %v858_v54 = vmul.f32 %v4794_v62, %v5541_v49  ;;  %2599 = vmatpush.bf16.msrb.mxu3 %v3393_v17  ;;  %2575 = vmatpush.bf16.msrb.mxu1 %v3375_v28  ;;  %v3391_v17 = vld [vmem:[#allocation4 + $0x90] sm:$0xff] }
 0x200   : > { %5539 = vst [vmem:[#allocation12_spill] sm:$0xff] %v4885_v27  ;;  %v1404_v59 = vsel %vm4836_vm5, %v1403_v46, %v1399_v11  ;;  %v1174_v6 = vsel %vm1173_vm11, %v4821_v52, %v1170_v35  ;;  %3612 = vpow2.f32 %v3002_v16  ;;  %v1336_v42 = vpop.f32.mrf.mxu1  ;;  %v4905_v14 = vadd.f32 1.0, %v3609_v29  ;;  %2589 = vmatpush.bf16.msra.mxu2 %v3382_v39  ;;  %v3402_v46 = vld [vmem:[#allocation4 + $0xe8] sm:$0xff]  ;;  %v3420_v16 = vld [vmem:[#allocation4 + $0x178] sm:$0xff]  ;;  %v5544_v39 = vld [vmem:[#allocation11_spill] sm:$0xff] }
 0x201   : > { %v1541_v53 = vmul.f32 %v1404_v59, %v4685_v55  ;;  %v1179_v8 = vsel %vm4877_vm10, %v1178_v30, %v1174_v6  ;;  %v3004_v37 = vmul.f32 -1.442695, %v4897_v61  ;;  %v4913_v52 = vadd.f32 %v4833_v33, %v4231_v3  ;;  %2611 = vmatpush.bf16.msrb.mxu0 %v3402_v46  ;;  %v3392_v30 = vld [vmem:[#allocation4 + $0x98] sm:$0xff]  ;;  %v3374_v23 = vld [vmem:[#allocation4 + $0x8] sm:$0xff]  ;;  %v3401_v42 = vld [vmem:[#allocation4 + $0xe0] sm:$0xff] }
 0x202   : > { %v3611_v24 = vpop.eup %3610  ;;  %v1204_v56 = vmul.f32 %v1179_v8, %v4688_v20  ;;  %v1438_v41 = vsub.f32 1.0, %v1437_v43  ;;  %3614 = vrcp.f32 %v4905_v14  ;;  %v1409_v62 = vmul.f32 %v4854_v18, %v1408_v15 }
 0x203   : > { %v4916_v55 = vadd.f32 %v1541_v53, %v4667_v44  ;;  %v1415_v20 = vand.u32 2147483647, %v4807_v38  ;;  %v4923_v40 = vadd.f32 1.0, %v3611_v24  ;;  %3616 = vpow2.f32 %v3004_v37  ;;  %2600 = vmatpush.bf16.msrb.mxu3 %v3392_v30  ;;  %2576 = vmatpush.bf16.msrb.mxu1 %v3374_v23 }
 0x204   : > { %v4919_v9 = vadd.f32 %v1204_v56, %v858_v54  ;;  %v3005_v33 = vmul.f32 -1.442695, %v4913_v52  ;;  %v1417_v35 = vand.u32 2147483648, %v4807_v38  ;;  %vm1411_vm13 = vweird.f32 %v4807_v38  ;;  %2590 = vmatpush.bf16.msra.mxu2 %v3381_v48  ;;  %v3400_v48 = vld [vmem:[#allocation4 + $0xd8] sm:$0xff] }
 0x205   : > { %v1310_v44 = vpop.f32.mrf.mxu3  ;;  %v1439_v11 = vmul.f32 %v4860_v0, %v1438_v41  ;;  %3618 = vrcp.f32 %v4923_v40  ;;  %v1410_v29 = vadd.f32 %v4854_v18, %v1409_v62  ;;  %vm1412_vm14 = vweird.f32 %v4854_v18  ;;  %2612 = vmatpush.bf16.msrb.mxu0 %v3401_v42  ;;  %v3419_v41 = vld [vmem:[#allocation4 + $0x170] sm:$0xff] }
 0x206   : > { %v3613_v7 = vpop.eup %3612  ;;  %v1349_v63 = vpop.f32.mrf.mxu2  ;;  %vm4932_vm15 = vcmp.eq.f32.partialorder %v1415_v20, 8.507059e+37  ;;  %v1445_v8 = vand.u32 2147483647, %v4812_v51  ;;  %3620 = vpow2.f32 %v3005_v33  ;;  %v4945_v24 = vadd.f32 %v4866_v19, %v5544_v39  ;;  %vm4959_vm12 = vmor %vm1411_vm13, %vm1412_vm14  ;;  %v3373_v20 = vld [vmem:[#allocation4] sm:$0xff] }
 0x207   : > { %v1588_v43 = vpop.f32.mrf.mxu0  ;;  %v4936_v6 = vadd.f32 1.0, %v3613_v7  ;;  %v4949_v49 = vadd.f32 %v4882_v10, %v4277_v22  ;;  %v1418_v54 = vor.u32 1.1754944e-38, %v1417_v35  ;;  %vm1441_vm0 = vweird.f32 %v4812_v51  ;;  %2601 = vmatpush.bf16.msrb.mxu3 %v3391_v17  ;;  %2577 = vmatpush.bf16.msrb.mxu1 %v3373_v20 }
 0x208   : > { %v4938_v15 = vpop.f32.mrf.mxu1  ;;  %2635 = vmatpush.bf16.msrb.mxu2 %v3420_v16  ;;  %v4940_v53 = vpop.eup %3614  ;;  %v1447_v56 = vand.u32 2147483648, %v4812_v51  ;;  %v1440_v10 = vadd.f32 %v4860_v0, %v1439_v11  ;;  %vm1442_vm1 = vweird.f32 %v4860_v0  ;;  %v1460_v62 = vand.u32 2147483647, %v4905_v14  ;;  %v3412_v11 = vld [vmem:[#allocation4 + $0x138] sm:$0xff] }
 0x209   : > { %v1452_v37 = vmul.f32 %v4940_v53, %v4905_v14  ;;  %v3617_v28 = vpop.eup %3616  ;;  %3622 = vrcp.f32 %v4936_v6  ;;  %v1414_v46 = vsel %vm4959_vm12, %v4854_v18, %v1410_v29  ;;  %v3003_v38 = vmul.f32 -1.442695, %v4945_v24  ;;  %vm4990_vm3 = vmor %vm1441_vm0, %vm1442_vm1  ;;  %2613 = vmatpush.bf16.msrb.mxu0 %v3400_v48 }
 0x20a   : > { %v4970_v44 = vadd.f32 1.0, %v3617_v28  ;;  %vm4975_vm2 = vcmp.eq.f32.partialorder %v1445_v8, 8.507059e+37  ;;  %v1462_v63 = vand.u32 2147483648, %v4905_v14  ;;  %v3006_v30 = vmul.f32 -1.442695, %v4949_v49  ;;  %v3390_v8 = vld [vmem:[#allocation4 + $0x88] sm:$0xff] }
 0x20b   : > { %v1453_v33 = vsub.f32 1.0, %v1452_v37  ;;  %v4973_v7 = vpop.eup %3618  ;;  %v4982_v18 = vadd.f32 %v1588_v43, %v4176_v25  ;;  %v1448_v29 = vor.u32 1.1754944e-38, %v1447_v56  ;;  %vm1457_vm4 = vweird.f32 %v4940_v53  ;;  %v3418_v37 = vld [vmem:[#allocation4 + $0x168] sm:$0xff]  ;;  %2622 = vmatpush.bf16.msra.mxu1 %v3412_v11  ;;  %2602 = vmatpush.bf16.msrb.mxu3 %v3390_v8 }
 0x20c   : > { %2636 = vmatpush.bf16.msrb.mxu2 %v3419_v41  ;;  %v1422_v25 = vmul.f32 %v4973_v7, %v4923_v40  ;;  %v3621_v17 = vpop.eup %3620  ;;  %v1419_v51 = vsel %vm4932_vm15, %v1418_v54, %v1414_v46  ;;  %v1444_v56 = vsel %vm4990_vm3, %v4860_v0, %v1440_v10  ;;  %vm1456_vm5 = vweird.f32 %v4905_v14  ;;  %v3399_v54 = vld [vmem:[#allocation4 + $0xd0] sm:$0xff] }
 0x20d   : > { %v4984_v16 = vpop.f32.mrf.mxu3  ;;  %v1454_v42 = vmul.f32 %v4940_v53, %v1453_v33  ;;  %3624 = vrcp.f32 %v4970_v44  ;;  %vm5008_vm6 = vcmp.eq.f32.partialorder %v1460_v62, 8.507059e+37  ;;  %v5012_v20 = vadd.f32 1.0, %v3621_v17  ;;  %v3411_v0 = vld [vmem:[#allocation4 + $0x130] sm:$0xff]  ;;  %vm1458_vm7 = vmor %vm1456_vm5, %vm1457_vm4  ;;  %2614 = vmatpush.bf16.msrb.mxu0 %v3399_v54 }
 0x20e   : > { %v4998_v43 = vpop.f32.mrf.mxu2  ;;  %3626 = vpow2.f32 %v3003_v38  ;;  %v1463_v14 = vor.u32 1.1754944e-38, %v1462_v63  ;;  %v1423_v46 = vsub.f32 1.0, %v1422_v25  ;;  %v3018_v62 = vmul.f32 -1.442695, %v4982_v18 }
 0x20f   : > { %v1590_v41 = vpop.f32.mrf.mxu0  ;;  %v1455_v28 = vadd.f32 %v4940_v53, %v1454_v42  ;;  %v5014_v10 = vpop.eup %3622  ;;  %3628 = vpow2.f32 %v3006_v30  ;;  %v1449_v33 = vsel %vm4975_vm2, %v1448_v29, %v1444_v56  ;;  %v1432_v48 = vand.u32 2147483648, %v4923_v40  ;;  %2623 = vmatpush.bf16.msra.mxu1 %v3411_v0 }
 0x210   : > { %v1603_v59 = vpop.f32.mrf.mxu1  ;;  %2637 = vmatpush.bf16.msrb.mxu2 %v3418_v37  ;;  %v1467_v11 = vmul.f32 %v5014_v10, %v4936_v6  ;;  %v1430_v63 = vand.u32 2147483647, %v4923_v40  ;;  %3630 = vrcp.f32 %v5012_v20  ;;  %v5030_v30 = vmul.f32 %v1419_v51, %v4695_v26  ;;  %v3409_v41 = vld [vmem:[#allocation4 + $0x120] sm:$0xff] }
 0x211   : > { %v1459_v38 = vsel %vm1458_vm7, %v4940_v53, %v1455_v28  ;;  %vm1426_vm8 = vweird.f32 %v4923_v40  ;;  %v5037_v29 = vmul.f32 %v1449_v33, %v4727_v58  ;;  %v1424_v42 = vmul.f32 %v4973_v7, %v1423_v46 }
 0x212   : > { %v1464_v23 = vsel %vm5008_vm6, %v1463_v14, %v1459_v38  ;;  %v1468_v25 = vsub.f32 1.0, %v1467_v11  ;;  %3632 = vpow2.f32 %v3018_v62  ;;  %v5043_v26 = vor.u32 1.1754944e-38, %v1432_v48 }
 0x213   : > { %v1545_v35 = vmul.f32 %v1464_v23, %v4784_v5  ;;  %v5034_v53 = vpop.eup %3624  ;;  %v5049_v51 = vadd.f32 %v4938_v15, %v5531_v1  ;;  %vm5051_vm9 = vcmp.eq.f32.partialorder %v1430_v63, 8.507059e+37  ;;  %vm1471_vm10 = vweird.f32 %v4936_v6  ;;  %v3389_v23 = vld [vmem:[#allocation4 + $0x80] sm:$0xff] }
 0x214   : > { %v3627_v37 = vpop.eup %3626  ;;  %v1497_v5 = vmul.f32 %v5034_v53, %v4970_v44  ;;  %v1505_v28 = vand.u32 2147483647, %v4970_v44  ;;  %v1507_v19 = vand.u32 2147483648, %v4970_v44  ;;  %vm1427_vm11 = vweird.f32 %v4973_v7  ;;  %v3417_v63 = vld [vmem:[#allocation4 + $0x160] sm:$0xff]  ;;  %2603 = vmatpush.bf16.msrb.mxu3 %v3389_v23 }
 0x215   : > { %v1577_v8 = vpop.f32.mrf.mxu3  ;;  %v5041_v17 = vadd.f32 %v1545_v35, %v4763_v32  ;;  %v3629_v56 = vpop.eup %3628  ;;  %v5059_v59 = vadd.f32 1.0, %v3627_v37  ;;  %v1477_v1 = vand.u32 2147483648, %v4936_v6  ;;  %vm1501_vm13 = vweird.f32 %v4970_v44  ;;  %v3428_v37 = vld [vmem:[#allocation4 + $0x1b8] sm:$0xff]  ;;  %vm5090_vm12 = vmor %vm1426_vm8, %vm1427_vm11  ;;  %2638 = vmatpush.bf16.msrb.mxu2 %v3417_v63  ;;  %v3410_v32 = vld [vmem:[#allocation4 + $0x128] sm:$0xff] }
 0x216   : > { %v1616_v58 = vpop.f32.mrf.mxu2  ;;  %v1498_v15 = vsub.f32 1.0, %v1497_v5  ;;  %v5068_v14 = vpop.eup %3630  ;;  %v1425_v46 = vadd.f32 %v4973_v7, %v1424_v42  ;;  %v1469_v62 = vmul.f32 %v5014_v10, %v1468_v25  ;;  %v5073_v33 = vadd.f32 1.0, %v3629_v56  ;;  %2624 = vmatpush.bf16.msra.mxu1 %v3410_v32 }
 0x217   : > { %v5061_v54 = vpop.f32.mrf.mxu0  ;;  %3634 = vrcp.f32 %v5059_v59  ;;  %vm1502_vm14 = vweird.f32 %v5034_v53  ;;  %v1512_v48 = vmul.f32 %v5068_v14, %v5012_v20  ;;  %v3019_v11 = vmul.f32 -1.442695, %v5049_v51 }
 0x218   : > { %v5066_v0 = vpop.f32.mrf.mxu1  ;;  %v1499_v38 = vmul.f32 %v5034_v53, %v1498_v15  ;;  %v3633_v35 = vpop.eup %3632  ;;  %vm1472_vm15 = vweird.f32 %v5014_v10  ;;  %vm5081_vm0 = vcmp.eq.f32.partialorder %v1505_v28, 8.507059e+37  ;;  %v1508_v25 = vor.u32 1.1754944e-38, %v1507_v19  ;;  %v3398_v19 = vld [vmem:[#allocation4 + $0xc8] sm:$0xff]  ;;  %vm5108_vm1 = vmor %vm1501_vm13, %vm1502_vm14  ;;  %2648 = vmatpush.bf16.msra.mxu3 %v3428_v37  ;;  %v3397_v37 = vld [vmem:[#allocation4 + $0xc0] sm:$0xff] }
 0x219   : > { %v1520_v8 = vand.u32 2147483647, %v5012_v20  ;;  %v1513_v56 = vsub.f32 1.0, %v1512_v48  ;;  %v1522_v28 = vand.u32 2147483648, %v5012_v20  ;;  %v5098_v15 = vadd.f32 %v4984_v16, %v4174_v21  ;;  %2615 = vmatpush.bf16.msrb.mxu0 %v3398_v19  ;;  %vm5137_vm4 = vmor %vm1471_vm10, %vm1472_vm15  ;;  %v3436_v19 = vld [vmem:[#allocation4 + $0x1f8] sm:$0xff] }
 0x21a   : > { %v1500_v58 = vadd.f32 %v5034_v53, %v1499_v38  ;;  %v1429_v40 = vsel %vm5090_vm12, %v4973_v7, %v1425_v46  ;;  %v1470_v27 = vadd.f32 %v5014_v10, %v1469_v62  ;;  %3636 = vrcp.f32 %v5073_v33  ;;  %v3416_v62 = vld [vmem:[#allocation4 + $0x158] sm:$0xff]  ;;  %2625 = vmatpush.bf16.msra.mxu1 %v3409_v41 }
 0x21b   : > { %v5113_v21 = vadd.f32 1.0, %v3633_v35  ;;  %v1514_v46 = vmul.f32 %v5068_v14, %v1513_v56  ;;  %vm1517_vm2 = vweird.f32 %v5068_v14  ;;  %3638 = vpow2.f32 %v3019_v11  ;;  %v3427_v35 = vld [vmem:[#allocation4 + $0x1b0] sm:$0xff]  ;;  %2639 = vmatpush.bf16.msrb.mxu2 %v3416_v62 }
 0x21c   : > { %v1504_v7 = vsel %vm5108_vm1, %v5034_v53, %v1500_v58  ;;  %v1478_v23 = vor.u32 1.1754944e-38, %v1477_v1  ;;  %vm1516_vm3 = vweird.f32 %v5012_v20  ;;  %v1434_v11 = vsel %vm5051_vm9, %v5043_v26, %v1429_v40  ;;  %2649 = vmatpush.bf16.msra.mxu3 %v3427_v35 }
 0x21d   : > { %v5115_v16 = vpop.f32.mrf.mxu3  ;;  %v5124_v48 = vpop.eup %3634  ;;  %v1509_v63 = vsel %vm5081_vm0, %v1508_v25, %v1504_v7  ;;  %3640 = vrcp.f32 %v5113_v21  ;;  %v1515_v20 = vadd.f32 %v5068_v14, %v1514_v46  ;;  %v1474_v26 = vsel %vm5137_vm4, %v5014_v10, %v1470_v27  ;;  %vm5150_vm5 = vmor %vm1516_vm3, %vm1517_vm2  ;;  %2616 = vmatpush.bf16.msrb.mxu0 %v3397_v37 }
 0x21e   : > { %v5122_v44 = vpop.f32.mrf.mxu2  ;;  %v1548_v1 = vmul.f32 %v1509_v63, %v4897_v61  ;;  %v1482_v42 = vmul.f32 %v5124_v48, %v5059_v59  ;;  %vm5154_vm6 = vcmp.eq.f32.partialorder %v1520_v8, 8.507059e+37  ;;  %v1523_v58 = vor.u32 1.1754944e-38, %v1522_v28  ;;  %v3415_v8 = vld [vmem:[#allocation4 + $0x150] sm:$0xff] }
 0x21f   : > { %v1642_v53 = vpop.f32.mrf.mxu0  ;;  %v3017_v56 = vmul.f32 -1.442695, %v5098_v15  ;;  %v1519_v27 = vsel %vm5150_vm5, %v5068_v14, %v1515_v20  ;;  %v5167_v38 = vadd.f32 %v4998_v43, %v4168_v12  ;;  %v5173_v7 = vadd.f32 %v5030_v30, %v4620_v31  ;;  %v3426_v12 = vld [vmem:[#allocation4 + $0x1a8] sm:$0xff]  ;;  %2640 = vmatpush.bf16.msrb.mxu2 %v3415_v8  ;;  %v3408_v31 = vld [vmem:[#allocation4 + $0x118] sm:$0xff]  ;;  %v3413_v8 = vld [vmem:[#allocation4 + $0x140] sm:$0xff] }
 0x220   : > { %v1655_v25 = vpop.f32.mrf.mxu1  ;;  %v5160_v40 = vadd.f32 %v1548_v1, %v4809_v2  ;;  %v1483_v10 = vsub.f32 1.0, %v1482_v42  ;;  %v5169_v28 = vpop.eup %3636  ;;  %v1543_v2 = vmul.f32 %v1434_v11, %v4819_v57  ;;  %v5567_v46 = vand.u32 2147483647, %v4936_v6  ;;  %2650 = vmatpush.bf16.msra.mxu3 %v3426_v12  ;;  %2626 = vmatpush.bf16.msra.mxu1 %v3408_v31  ;;  %v3424_v12 = vld [vmem:[#allocation4 + $0x198] sm:$0xff] }
 0x221   : > { %v1524_v14 = vsel %vm5154_vm6, %v1523_v58, %v1519_v27  ;;  %2661 = vmatpush.bf16.msra.mxu0 %v3436_v19  ;;  %v3639_v43 = vpop.eup %3638  ;;  %v1490_v53 = vand.u32 2147483647, %v5059_v59  ;;  %3642 = vpow2.f32 %v3017_v56  ;;  %v3020_v35 = vmul.f32 -1.442695, %v5167_v38  ;;  %v3414_v25 = vld [vmem:[#allocation4 + $0x148] sm:$0xff] }
 0x222   : > { %vm1476_vm7 = vcmp.eq.f32.partialorder %v5567_v46, 8.507059e+37  ;;  %v1549_v63 = vmul.f32 %v1524_v14, %v4913_v52  ;;  %v1484_v57 = vmul.f32 %v5124_v48, %v1483_v10  ;;  %v5185_v6 = vadd.f32 1.0, %v3639_v43  ;;  %v3435_v52 = vld [vmem:[#allocation4 + $0x1f0] sm:$0xff]  ;;  %v3434_v56 = vld [vmem:[#allocation4 + $0x1e8] sm:$0xff] }
 0x223   : > { %v1479_v62 = vsel %vm1476_vm7, %v1478_v23, %v1474_v26  ;;  %v5182_v30 = vpop.eup %3640  ;;  %v5190_v11 = vadd.f32 %v5061_v54, %v5534_v4  ;;  %v5194_v32 = vadd.f32 %v5037_v29, %v4671_v47  ;;  %vm1486_vm8 = vweird.f32 %v5059_v59  ;;  %v3425_v29 = vld [vmem:[#allocation4 + $0x1a0] sm:$0xff]  ;;  %2641 = vmatpush.bf16.msrb.mxu2 %v3414_v25 }
 0x224   : > { %v5197_v1 = vadd.f32 %v1549_v63, %v4919_v9  ;;  %v1752_v20 = vmul.f32 %v5182_v30, %v5113_v21  ;;  %v5203_v4 = vadd.f32 %v1543_v2, %v4623_v34  ;;  %v1492_v54 = vand.u32 2147483648, %v5059_v59  ;;  %v3407_v34 = vld [vmem:[#allocation4 + $0x110] sm:$0xff]  ;;  %2651 = vmatpush.bf16.msra.mxu3 %v3425_v29  ;;  %v3406_v63 = vld [vmem:[#allocation4 + $0x108] sm:$0xff] }
 0x225   : > { %v1629_v23 = vpop.f32.mrf.mxu3  ;;  %v1527_v47 = vmul.f32 %v5169_v28, %v5073_v33  ;;  %3644 = vrcp.f32 %v5185_v6  ;;  %2662 = vmatpush.bf16.msra.mxu0 %v3435_v52  ;;  %v1546_v37 = vmul.f32 %v1479_v62, %v4852_v60  ;;  %vm5212_vm9 = vcmp.eq.f32.partialorder %v1490_v53, 8.507059e+37  ;;  %2627 = vmatpush.bf16.msra.mxu1 %v3407_v34 }
 0x226   : > { %v1668_v42 = vpop.f32.mrf.mxu2  ;;  %v1753_v26 = vsub.f32 1.0, %v1752_v20  ;;  %3646 = vpow2.f32 %v3020_v35  ;;  %v1485_v5 = vadd.f32 %v5124_v48, %v1484_v57  ;;  %vm1487_vm10 = vweird.f32 %v5124_v48 }
 0x227   : > { %v5209_v9 = vpop.f32.mrf.mxu0  ;;  %v1762_v61 = vand.u32 2147483648, %v5113_v21  ;;  %v3022_v58 = vmul.f32 -1.442695, %v5190_v11  ;;  %v3643_v19 = vpop.eup %3642  ;;  %vm1757_vm11 = vweird.f32 %v5182_v30  ;;  %v1760_v27 = vand.u32 2147483647, %v5113_v21  ;;  %vm5236_vm13 = vmor %vm1486_vm8, %vm1487_vm10  ;;  %2642 = vmatpush.bf16.msrb.mxu2 %v3413_v8 }
 0x228   : > { %v1754_v60 = vmul.f32 %v5182_v30, %v1753_v26  ;;  %v5225_v10 = vadd.f32 %v5066_v0, %v5544_v39  ;;  %v1493_v2 = vor.u32 1.1754944e-38, %v1492_v54  ;;  %v1528_v46 = vsub.f32 1.0, %v1527_v47  ;;  %2652 = vmatpush.bf16.msra.mxu3 %v3424_v12 }
 0x229   : > { %v5227_v14 = vadd.f32 1.0, %v3643_v19  ;;  %3648 = vpow2.f32 %v3022_v58  ;;  %2663 = vmatpush.bf16.msra.mxu0 %v3434_v56  ;;  %v5230_v43 = vadd.f32 %v1546_v37, %v4730_v50  ;;  %vm1756_vm14 = vweird.f32 %v5113_v21  ;;  %v3433_v21 = vld [vmem:[#allocation4 + $0x1e0] sm:$0xff]  ;;  %2628 = vmatpush.bf16.msra.mxu1 %v3406_v63  ;;  %v3452_v63 = vld [vmem:[#allocation4 + $0x278] sm:$0xff] }
 0x22a   : > { %v1755_v39 = vadd.f32 %v5182_v30, %v1754_v60  ;;  %v3023_v0 = vmul.f32 -1.442695, %v5225_v10  ;;  %v1489_v50 = vsel %vm5236_vm13, %v5124_v48, %v1485_v5  ;;  %vm1758_vm15 = vmor %vm1756_vm14, %vm1757_vm11  ;;  %v1763_v59 = vor.u32 1.1754944e-38, %v1762_v61  ;;  %v3432_v5 = vld [vmem:[#allocation4 + $0x1d8] sm:$0xff] }
 0x22b   : > { %v5243_v53 = vpop.eup %3644  ;;  %v1775_v31 = vand.u32 2147483647, %v5185_v6  ;;  %3650 = vrcp.f32 %v5227_v14  ;;  %vm1761_vm0 = vcmp.eq.f32.partialorder %v1760_v27, 8.507059e+37  ;;  %v5259_v48 = vadd.f32 %v5115_v16, %v4172_v13  ;;  %v3405_v13 = vld [vmem:[#allocation4 + $0x100] sm:$0xff] }
 0x22c   : > { %v3647_v35 = vpop.eup %3646  ;;  %v1759_v23 = vsel %vm1758_vm15, %v5182_v30, %v1755_v39  ;;  %v1767_v52 = vmul.f32 %v5243_v53, %v5185_v6  ;;  %v5262_v20 = vmul.f32 %v5169_v28, %v1528_v46  ;;  %v1777_v25 = vand.u32 2147483648, %v5185_v6  ;;  %v3423_v30 = vld [vmem:[#allocation4 + $0x190] sm:$0xff] }
 0x22d   : > { %v5252_v57 = vpop.f32.mrf.mxu3  ;;  %v1764_v42 = vsel %vm1761_vm0, %v1763_v59, %v1759_v23  ;;  %v5265_v54 = vadd.f32 1.0, %v3647_v35  ;;  %2664 = vmatpush.bf16.msra.mxu0 %v3433_v21  ;;  %v1494_v29 = vsel %vm5212_vm9, %v1493_v2, %v1489_v50  ;;  %3652 = vpow2.f32 %v3023_v0  ;;  %2653 = vmatpush.bf16.msra.mxu3 %v3423_v30  ;;  %v3422_v2 = vld [vmem:[#allocation4 + $0x188] sm:$0xff]  ;;  %v3431_v59 = vld [vmem:[#allocation4 + $0x1d0] sm:$0xff] }
 0x22e   : > { %v1887_v37 = vmul.f32 %v1764_v42, %v4982_v18  ;;  %v1768_v26 = vsub.f32 1.0, %v1767_v52  ;;  %vm1771_vm12 = vweird.f32 %v5185_v6  ;;  %vm1772_vm1 = vweird.f32 %v5243_v53  ;;  %2629 = vmatpush.bf16.msra.mxu1 %v3405_v13 }
 0x22f   : > { %v1694_v47 = vpop.f32.mrf.mxu0  ;;  %v3649_v16 = vpop.eup %3648  ;;  %vm5272_vm2 = vcmp.eq.f32.partialorder %v1775_v31, 8.507059e+37  ;;  %3654 = vrcp.f32 %v5265_v54  ;;  %v3021_v58 = vmul.f32 -1.442695, %v5259_v48  ;;  %v5285_v19 = vmul.f32 %v1494_v29, %v4945_v24  ;;  %vm5297_vm4 = vmor %vm1771_vm12, %vm1772_vm1 }
 0x230   : > { %v1897_v41 = vadd.f32 %v1887_v37, %v5173_v7  ;;  %v1769_v18 = vmul.f32 %v5243_v53, %v1768_v26  ;;  %v5279_v61 = vadd.f32 1.0, %v3649_v16  ;;  %v1778_v60 = vor.u32 1.1754944e-38, %v1777_v25  ;;  %v3421_v25 = vld [vmem:[#allocation4 + $0x180] sm:$0xff]  ;;  %v3451_v26 = vld [vmem:[#allocation4 + $0x270] sm:$0xff] }
 0x231   : > { %v5282_v56 = vpop.eup %3650  ;;  %v1745_v27 = vand.u32 2147483647, %v5227_v14  ;;  %v1747_v8 = vand.u32 2147483648, %v5227_v14  ;;  %2665 = vmatpush.bf16.msra.mxu0 %v3432_v5  ;;  %vm1741_vm3 = vweird.f32 %v5227_v14  ;;  %v1790_v62 = vand.u32 2147483647, %v5265_v54  ;;  %2654 = vmatpush.bf16.msra.mxu3 %v3422_v2 }
 0x232   : > { %v1907_v7 = vmul.f32 0.25, %v1897_v41  ;;  %v1770_v46 = vadd.f32 %v5243_v53, %v1769_v18  ;;  %v1737_v12 = vmul.f32 %v5282_v56, %v5227_v14  ;;  %v1792_v39 = vand.u32 2147483648, %v5265_v54 }
 0x233   : > { %3656 = vrcp.f32 %v5279_v61  ;;  %v5306_v0 = vadd.f32 %v5122_v44, %v5540_v36  ;;  %v3653_v31 = vpop.eup %3652  ;;  %vm5313_vm5 = vcmp.eq.f32.partialorder %v1745_v27, 8.507059e+37  ;;  %v1748_v36 = vor.u32 1.1754944e-38, %v1747_v8 }
 0x234   : > { %v1917_v6 = vpack.c.bf16 %v1907_v7, %v1907_v7  ;;  %v1774_v21 = vsel %vm5297_vm4, %v5243_v53, %v1770_v46  ;;  %v1738_v35 = vsub.f32 1.0, %v1737_v12  ;;  %3658 = vpow2.f32 %v3021_v58  ;;  %v3450_v12 = vld [vmem:[#allocation4 + $0x268] sm:$0xff] }
 0x235   : > { %v1681_v50 = vpop.f32.mrf.mxu3  ;;  %v3655_v23 = vpop.eup %3654  ;;  %v1779_v52 = vsel %vm5272_vm2, %v1778_v60, %v1774_v21  ;;  %v5317_v44 = vadd.f32 1.0, %v3653_v31  ;;  %2666 = vmatpush.bf16.msra.mxu0 %v3431_v59  ;;  %vm1742_vm6 = vweird.f32 %v5282_v56  ;;  %vm1786_vm7 = vweird.f32 %v5265_v54  ;;  %2655 = vmatpush.bf16.msra.mxu3 %v3421_v25 }
 0x236   : > { %v1888_v47 = vmul.f32 %v1779_v52, %v5049_v51  ;;  %v1739_v30 = vmul.f32 %v5282_v56, %v1738_v35  ;;  %v1782_v53 = vmul.f32 %v3655_v23, %v5265_v54  ;;  %2591 = vmatmul.bf16.vlgmr.msra.gmra.mxu2 %v1917_v6  ;;  %vm5324_vm8 = vcmp.eq.f32.partialorder %v1790_v62, 8.507059e+37  ;;  %v3430_v51 = vld [vmem:[#allocation4 + $0x1c8] sm:$0xff]  ;;  %vm1743_vm9 = vmor %vm1741_vm3, %vm1742_vm6 }
 0x237   : > { %v1793_v37 = vor.u32 1.1754944e-38, %v1792_v39  ;;  %3660 = vrcp.f32 %v5317_v44  ;;  %2687 = vmatpush.bf16.msra.mxu2 %v3452_v63  ;;  %v3024_v5 = vmul.f32 -1.442695, %v5306_v0  ;;  %vm1787_vm10 = vweird.f32 %v3655_v23 }
 0x238   : > { %v1898_v13 = vadd.f32 %v1888_v47, %v5203_v4  ;;  %v1740_v16 = vadd.f32 %v5282_v56, %v1739_v30  ;;  %v1783_v34 = vsub.f32 1.0, %v1782_v53  ;;  %vm1816_vm11 = vweird.f32 %v5279_v61  ;;  %vm1788_vm13 = vmor %vm1786_vm7, %vm1787_vm10  ;;  %v3444_v30 = vld [vmem:[#allocation4 + $0x238] sm:$0xff] }
 0x239   : > { %v3657_v41 = vpop.eup %3656  ;;  %v1820_v18 = vand.u32 2147483647, %v5279_v61  ;;  %v5340_v58 = vadd.f32 %v5209_v9, %v4277_v22  ;;  %2667 = vmatpush.bf16.msra.mxu0 %v3430_v51  ;;  %v1822_v7 = vand.u32 2147483648, %v5279_v61  ;;  %3662 = vpow2.f32 %v3024_v5  ;;  %v3429_v22 = vld [vmem:[#allocation4 + $0x1c0] sm:$0xff] }
 0x23a   : > { %v3659_v4 = vpop.eup %3658  ;;  %v1908_v60 = vmul.f32 0.25, %v1898_v13  ;;  %v1744_v27 = vsel %vm1743_vm9, %v5282_v56, %v1740_v16  ;;  %v1784_v8 = vmul.f32 %v3655_v23, %v1783_v34  ;;  %v1812_v2 = vmul.f32 %v3657_v41, %v5279_v61  ;;  %v3448_v13 = vld [vmem:[#allocation4 + $0x258] sm:$0xff] }
 0x23b   : > { %v1749_v14 = vsel %vm5313_vm5, %v1748_v36, %v1744_v27  ;;  %v5347_v46 = vadd.f32 1.0, %v3659_v4  ;;  %2688 = vmatpush.bf16.msra.mxu2 %v3451_v26  ;;  %vm1817_vm14 = vweird.f32 %v3657_v41  ;;  %v3026_v63 = vmul.f32 -1.442695, %v5340_v58 }
 0x23c   : > { %v1918_v9 = vpack.c.bf16 %v1908_v60, %v1908_v60  ;;  %v1886_v24 = vmul.f32 %v1749_v14, %v5098_v15  ;;  %v1785_v62 = vadd.f32 %v3655_v23, %v1784_v8  ;;  %v1813_v39 = vsub.f32 1.0, %v1812_v2  ;;  %vm1818_vm0 = vmor %vm1816_vm11, %vm1817_vm14 }
 0x23d   : > { %v3661_v56 = vpop.eup %3660  ;;  %3664 = vrcp.f32 %v5347_v46  ;;  %v5357_v50 = vadd.f32 %v5252_v57, %v4231_v3  ;;  %2668 = vmatpush.bf16.msra.mxu0 %v3429_v22  ;;  %vm5363_vm15 = vcmp.eq.f32.partialorder %v1820_v18, 8.507059e+37  ;;  %v1823_v35 = vor.u32 1.1754944e-38, %v1822_v7  ;;  %v3449_v3 = vld [vmem:[#allocation4 + $0x260] sm:$0xff] }
 0x23e   : > { %v1896_v59 = vadd.f32 %v1886_v24, %v4916_v55  ;;  %v1789_v15 = vsel %vm1788_vm13, %v3655_v23, %v1785_v62  ;;  %v1814_v31 = vmul.f32 %v3657_v41, %v1813_v39  ;;  %v1827_v6 = vmul.f32 %v3661_v56, %v5317_v44  ;;  %2604 = vmatmul.bf16.vlgmr.msrb.gmra.mxu3 %v1918_v9 }
 0x23f   : > { %v1794_v54 = vsel %vm5324_vm8, %v1793_v37, %v1789_v15  ;;  %v1835_v52 = vand.u32 2147483647, %v5317_v44  ;;  %2689 = vmatpush.bf16.msra.mxu2 %v3450_v12  ;;  %v3663_v36 = vpop.eup %3662  ;;  %vm1832_vm12 = vweird.f32 %v3661_v56  ;;  %v1837_v25 = vand.u32 2147483648, %v5317_v44 }
 0x240   : > { %v1906_v57 = vmul.f32 0.25, %v1896_v59  ;;  %v1889_v55 = vmul.f32 %v1794_v54, %v5167_v38  ;;  %v1815_v23 = vadd.f32 %v3657_v41, %v1814_v31  ;;  %v1828_v42 = vsub.f32 1.0, %v1827_v6 }
 0x241   : > { %3666 = vpow2.f32 %v3026_v63  ;;  %v3025_v47 = vmul.f32 -1.442695, %v5357_v50  ;;  %vm1831_vm1 = vweird.f32 %v5317_v44  ;;  %v5378_v61 = vadd.f32 1.0, %v3663_v36  ;;  %v3443_v44 = vld [vmem:[#allocation4 + $0x230] sm:$0xff] }
 0x242   : > { %v1916_v53 = vpack.c.bf16 %v1906_v57, %v1906_v57  ;;  %v1899_v29 = vadd.f32 %v1889_v55, %v5194_v32  ;;  %v1819_v37 = vsel %vm1818_vm0, %v3657_v41, %v1815_v23  ;;  %v1829_v26 = vmul.f32 %v3661_v56, %v1828_v42  ;;  %vm1833_vm2 = vmor %vm1831_vm1, %vm1832_vm12 }
 0x243   : > { %v3665_v38 = vpop.eup %3664  ;;  %v1824_v51 = vsel %vm5363_vm15, %v1823_v35, %v1819_v37  ;;  %3668 = vpow2.f32 %v3025_v47  ;;  %2690 = vmatpush.bf16.msra.mxu2 %v3449_v3  ;;  %v1557_v32 = vadd.f32 %v5285_v19, %v4749_v45  ;;  %vm1836_vm3 = vcmp.eq.f32.partialorder %v1835_v52, 8.507059e+37  ;;  %v3447_v19 = vld [vmem:[#allocation4 + $0x250] sm:$0xff]  ;;  %v3441_v35 = vld [vmem:[#allocation4 + $0x220] sm:$0xff]  ;;  %v3440_v37 = vld [vmem:[#allocation4 + $0x218] sm:$0xff] }
 0x244   : > { %v1909_v16 = vmul.f32 0.25, %v1899_v29  ;;  %v1891_v34 = vmul.f32 %v1824_v51, %v5190_v11  ;;  %v1830_v5 = vadd.f32 %v3661_v56, %v1829_v26  ;;  %v1797_v18 = vmul.f32 %v3665_v38, %v5347_v46  ;;  %2578 = vmatmul.bf16.vlgmr.msrb.gmra.mxu1 %v1916_v53  ;;  %v3511_v52 = vld [vmem:[%s5468_s6] ss:$0 sm:$0xff] }
 0x245   : > { %v1838_v41 = vor.u32 1.1754944e-38, %v1837_v25  ;;  %3670 = vrcp.f32 %v5378_v61  ;;  %2674 = vmatpush.bf16.msrb.mxu1 %v3444_v30  ;;  %vm1802_vm4 = vweird.f32 %v3665_v38  ;;  %v1805_v14 = vand.u32 2147483647, %v5347_v46  ;;  %v3445_v25 = vld [vmem:[#allocation4 + $0x240] sm:$0xff] }
 0x246   : > { %v1919_v4 = vpack.c.bf16 %v1909_v16, %v1909_v16  ;;  %v1901_v60 = vadd.f32 %v1891_v34, %v5230_v43  ;;  %v1834_v27 = vsel %vm1833_vm2, %v3661_v56, %v1830_v5  ;;  %v1798_v11 = vsub.f32 1.0, %v1797_v18  ;;  %v3442_v43 = vld [vmem:[#allocation4 + $0x228] sm:$0xff] }
 0x247   : > { %v3667_v8 = vpop.eup %3666  ;;  %v1839_v2 = vsel %vm1836_vm3, %v1838_v41, %v1834_v27  ;;  %v1807_v45 = vand.u32 2147483648, %v5347_v46  ;;  %2691 = vmatpush.bf16.msra.mxu2 %v3448_v13  ;;  %vm1801_vm5 = vweird.f32 %v5347_v46  ;;  %v1530_v59 = vadd.f32 %v5169_v28, %v5262_v20  ;;  %v3446_v46 = vld [vmem:[#allocation4 + $0x248] sm:$0xff] }
 0x248   : > { %v1911_v7 = vmul.f32 0.25, %v1901_v60  ;;  %v1892_v12 = vmul.f32 %v1839_v2, %v5225_v10  ;;  %v1799_v22 = vmul.f32 %v3665_v38, %v1798_v11  ;;  %v5390_v9 = vadd.f32 1.0, %v3667_v8  ;;  %2617 = vmatmul.bf16.vlgmr.msrb.gmra.mxu0 %v1919_v4  ;;  %vm1803_vm7 = vmor %vm1801_vm5, %vm1802_vm4 }
 0x249   : > { %v3669_v24 = vpop.eup %3668  ;;  %2675 = vmatpush.bf16.msrb.mxu1 %v3443_v44  ;;  %vm1532_vm6 = vweird.f32 %v5169_v28  ;;  %v1808_v10 = vor.u32 1.1754944e-38, %v1807_v45  ;;  %vm1806_vm8 = vcmp.eq.f32.partialorder %v1805_v14, 8.507059e+37  ;;  %vm1531_vm9 = vweird.f32 %v5073_v33 }
 0x24a   : > { %v1921_v62 = vpack.c.bf16 %v1911_v7, %v1911_v7  ;;  %v1902_v39 = vadd.f32 %v1892_v12, %v1557_v32  ;;  %v1800_v56 = vadd.f32 %v3665_v38, %v1799_v22  ;;  %3672 = vrcp.f32 %v5390_v9  ;;  %vm5406_vm10 = vmor %vm1531_vm9, %vm1532_vm6 }
 0x24b   : > { %v3671_v63 = vpop.eup %3670  ;;  %v5398_v15 = vadd.f32 1.0, %v3669_v24  ;;  %2692 = vmatpush.bf16.msra.mxu2 %v3447_v19  ;;  %v1537_v21 = vand.u32 2147483648, %v5073_v33  ;;  %v1535_v3 = vand.u32 2147483647, %v5073_v33  ;;  %v1534_v42 = vsel %vm5406_vm10, %v5169_v28, %v1530_v59  ;;  %v3437_v59 = vld [vmem:[#allocation4 + $0x200] sm:$0xff] }
 0x24c   : > { %v1912_v31 = vmul.f32 0.25, %v1902_v39  ;;  %v1804_v6 = vsel %vm1803_vm7, %v3665_v38, %v1800_v56  ;;  %v1842_v54 = vmul.f32 %v3671_v63, %v5378_v61  ;;  %2643 = vmatmul.bf16.vlgmr.msrb.gmra.mxu2 %v1921_v62  ;;  %v1852_v36 = vand.u32 2147483648, %v5378_v61 }
 0x24d   : > { %v1809_v20 = vsel %vm1806_vm8, %v1808_v10, %v1804_v6  ;;  %3674 = vrcp.f32 %v5398_v15  ;;  %2676 = vmatpush.bf16.msrb.mxu1 %v3442_v43  ;;  %vm1847_vm11 = vweird.f32 %v3671_v63  ;;  %v1850_v29 = vand.u32 2147483647, %v5378_v61 }
 0x24e   : > { %v1922_v57 = vpack.c.bf16 %v1912_v31, %v1912_v31  ;;  %v1890_v55 = vmul.f32 %v1809_v20, %v5259_v48  ;;  %v1843_v23 = vsub.f32 1.0, %v1842_v54  ;;  %v1538_v33 = vor.u32 1.1754944e-38, %v1537_v21 }
 0x24f   : > { %2693 = vmatpush.bf16.msra.mxu2 %v3446_v46  ;;  %vm1536_vm13 = vcmp.eq.f32.partialorder %v1535_v3, 8.507059e+37  ;;  %vm1846_vm14 = vweird.f32 %v5378_v61  ;;  %v1853_v13 = vor.u32 1.1754944e-38, %v1852_v36  ;;  %v1882_v16 = vand.u32 2147483648, %v5390_v9  ;;  %v3439_v61 = vld [vmem:[#allocation4 + $0x210] sm:$0xff] }
 0x250   : > { %v3673_v47 = vpop.eup %3672  ;;  %v1900_v30 = vadd.f32 %v1890_v55, %v5041_v17  ;;  %v1844_v53 = vmul.f32 %v3671_v63, %v1843_v23  ;;  %2656 = vmatmul.bf16.vlgmr.msra.gmra.mxu3 %v1922_v57  ;;  %v1539_v51 = vsel %vm1536_vm13, %v1538_v33, %v1534_v42  ;;  %vm1848_vm15 = vmor %vm1846_vm14, %vm1847_vm11  ;;  %vm1851_vm0 = vcmp.eq.f32.partialorder %v1850_v29, 8.507059e+37 }
 0x251   : > { %v1872_v48 = vmul.f32 %v3673_v47, %v5390_v9  ;;  %2677 = vmatpush.bf16.msrb.mxu1 %v3441_v35  ;;  %vm1877_vm12 = vweird.f32 %v3673_v47  ;;  %v1880_v44 = vand.u32 2147483647, %v5390_v9  ;;  %v1550_v4 = vmul.f32 %v1539_v51, %v4949_v49  ;;  %v3438_v49 = vld [vmem:[#allocation4 + $0x208] sm:$0xff] }
 0x252   : > { %v1910_v26 = vmul.f32 0.25, %v1900_v30  ;;  %v1845_v28 = vadd.f32 %v3671_v63, %v1844_v53  ;;  %vm1876_vm1 = vweird.f32 %v5390_v9  ;;  %v1883_v8 = vor.u32 1.1754944e-38, %v1882_v16  ;;  %v5584_v9 = vld [vmem:[#allocation12_spill] sm:$0xff] }
 0x253   : > { %v3675_v38 = vpop.eup %3674  ;;  %v1873_v17 = vsub.f32 1.0, %v1872_v48  ;;  %2694 = vmatpush.bf16.msra.mxu2 %v3445_v25  ;;  %v1867_v2 = vand.u32 2147483648, %v5398_v15  ;;  %vm1878_vm2 = vmor %vm1876_vm1, %vm1877_vm12  ;;  %v1865_v19 = vand.u32 2147483647, %v5398_v15  ;;  %vm1881_vm4 = vcmp.eq.f32.partialorder %v1880_v44, 8.507059e+37 }
 0x254   : > { %v1920_v34 = vpack.c.bf16 %v1910_v26, %v1910_v26  ;;  %v1849_v5 = vsel %vm1848_vm15, %v3671_v63, %v1845_v28  ;;  %v1857_v18 = vmul.f32 %v3675_v38, %v5398_v15  ;;  %vm1862_vm3 = vweird.f32 %v3675_v38 }
 0x255   : > { %v1854_v32 = vsel %vm1851_vm0, %v1853_v13, %v1849_v5  ;;  %v1874_v41 = vmul.f32 %v3673_v47, %v1873_v17  ;;  %2678 = vmatpush.bf16.msrb.mxu1 %v3440_v37  ;;  %vm1861_vm5 = vweird.f32 %v5398_v15  ;;  %v1560_v24 = vadd.f32 %v1550_v4, %v5584_v9 }
 0x256   : > { %v1893_v60 = vmul.f32 %v1854_v32, %v5306_v0  ;;  %v1858_v27 = vsub.f32 1.0, %v1857_v18  ;;  %2630 = vmatmul.bf16.vlgmr.msra.gmra.mxu1 %v1920_v34  ;;  %vm1863_vm6 = vmor %vm1861_vm5, %vm1862_vm3  ;;  %vm1866_vm7 = vcmp.eq.f32.partialorder %v1865_v19, 8.507059e+37  ;;  %vm2722_vm13 = vcmask 523264  }
 0x257   : > { %v1875_v11 = vadd.f32 %v3673_v47, %v1874_v41  ;;  %vm2731_vm14 = vcmask 516096  }
 0x258   : > { %v1903_v14 = vadd.f32 %v1893_v60, %v5160_v40  ;;  %v1859_v45 = vmul.f32 %v3675_v38, %v1858_v27  ;;  %v1868_v40 = vor.u32 1.1754944e-38, %v1867_v2 }
 0x259   : > { %v1879_v7 = vsel %vm1878_vm2, %v3673_v47, %v1875_v11  ;;  %2679 = vmatpush.bf16.msrb.mxu1 %v3439_v61 }
 0x25a   : > { %v1913_v0 = vmul.f32 0.25, %v1903_v14  ;;  %v1884_v12 = vsel %vm1881_vm4, %v1883_v8, %v1879_v7  ;;  %v1860_v22 = vadd.f32 %v3675_v38, %v1859_v45 }
 0x25b   : > { %v1895_v43 = vmul.f32 %v1884_v12, %v5340_v58 }
 0x25c   : > { %v1923_v62 = vpack.c.bf16 %v1913_v0, %v1913_v0  ;;  %v1864_v39 = vsel %vm1863_vm6, %v3675_v38, %v1860_v22 }
 0x25d   : > { %v1905_v56 = vadd.f32 %v1895_v43, %v1560_v24  ;;  %v1869_v63 = vsel %vm1866_vm7, %v1868_v40, %v1864_v39  ;;  %2680 = vmatpush.bf16.msrb.mxu1 %v3438_v49  ;;  %v2721_v40 = vld [vmem:[#allocation2] sm:$0x1] }
 0x25e   : > { %v1894_v10 = vmul.f32 %v1869_v63, %v5357_v50  ;;  %2669 = vmatmul.bf16.vlgmr.msra.gmra.mxu0 %v1923_v62 }
 0x25f   : > { %v1915_v46 = vmul.f32 0.25, %v1905_v56 }
 0x260   : > { %v1904_v31 = vadd.f32 %v1894_v10, %v5197_v1 }
 0x261   : > { %v1925_v15 = vpack.c.bf16 %v1915_v46, %v1915_v46  ;;  %2681 = vmatpush.bf16.msrb.mxu1 %v3437_v59 }
 0x262   : > { %v1914_v6 = vmul.f32 0.25, %v1904_v31 }
 0x263   : > { %2695 = vmatmul.bf16.vlgmr.msra.gmra.mxu2 %v1925_v15 }
 0x264   : > { %v1924_v58 = vpack.c.bf16 %v1914_v6, %v1914_v6 }
 0x266   : > { %2682 = vmatmul.bf16.vlgmr.msrb.gmra.mxu1 %v1924_v58  ;;  %v2733_v58 = vld [vmem:[#allocation3] sm:$0x1] }
 0x2b9   : > { %v2592_v54 = vpop.f32.mrf.mxu2 }
 0x2c1   : > { %v2579_v21 = vpop.f32.mrf.mxu1  ;;  %v2605_v20 = vpop.f32.mrf.mxu3 }
 0x2c2   : > { %v2594_v35 = vpop.f32.mrf.mxu2  ;;  %v2580_v50 = vadd.f32 %v3511_v52, %v2579_v21 }
 0x2c4   : > { %v2593_v23 = vadd.f32 %v2592_v54, %v2580_v50 }
 0x2c5   : > { %v2618_v3 = vpop.f32.mrf.mxu0 }
 0x2c6   : > { %v2606_v36 = vadd.f32 %v2605_v20, %v2593_v23 }
 0x2c8   : > { %v2619_v30 = vadd.f32 %v2618_v3, %v2606_v36 }
 0x2c9   : > { %v2581_v57 = vpop.f32.mrf.mxu1  ;;  %v2607_v55 = vpop.f32.mrf.mxu3 }
 0x2cd   : > { %v2620_v1 = vpop.f32.mrf.mxu0 }
 0x2cf   : > { %v2644_v42 = vpop.f32.mrf.mxu2 }
 0x2d3   : > { %v2631_v25 = vpop.f32.mrf.mxu1  ;;  %v2657_v47 = vpop.f32.mrf.mxu3 }
 0x2d4   : > { %v2632_v53 = vadd.f32 %v2631_v25, %v2619_v30 }
 0x2d6   : > { %v2645_v33 = vadd.f32 %v2644_v42, %v2632_v53 }
 0x2d7   : > { %v2646_v29 = vpop.f32.mrf.mxu2 }
 0x2d8   : > { %v2658_v28 = vadd.f32 %v2657_v47, %v2645_v33 }
 0x2db   : > { %v2670_v48 = vpop.f32.mrf.mxu0  ;;  %v2633_v37 = vpop.f32.mrf.mxu1 }
 0x2dc   : > { %v2659_v26 = vpop.f32.mrf.mxu3  ;;  %v2671_v38 = vadd.f32 %v2670_v48, %v2658_v28 }
 0x2e3   : > { %v2672_v51 = vpop.f32.mrf.mxu0  ;;  %v2683_v13 = vpop.f32.mrf.mxu1 }
 0x2e4   : > { %v2684_v17 = vadd.f32 %v2683_v13, %v2671_v38 }
 0x2e6   : > { %v2696_v16 = vpop.f32.mrf.mxu2 }
 0x2e7   : > { %v2697_v34 = vadd.f32 %v2696_v16, %v2684_v17 }
 0x2e9   : > { %v3347_v5 = vmul.f32 -1.442695, %v2697_v34 }
 0x2eb   : > { %3676 = vpow2.f32 %v3347_v5  ;;  %v2685_v18 = vpop.f32.mrf.mxu1 }
 0x2ee   : > { %v2698_v32 = vpop.f32.mrf.mxu2 }
 0x2f1   : > { %v3677_v41 = vpop.eup %3676 }
 0x2f2   : > { %v2703_v44 = vadd.f32 1.0, %v3677_v41 }
 0x2f4   : > { %3678 = vrcp.f32 %v2703_v44  ;;  %v2715_v27 = vand.u32 2147483648, %v2703_v44  ;;  %v2713_v8 = vand.u32 2147483647, %v2703_v44  ;;  %vm2709_vm9 = vweird.f32 %v2703_v44 }
 0x2f6   : > { %v2716_v14 = vor.u32 1.1754944e-38, %v2715_v27  ;;  %vm2714_vm11 = vcmp.eq.f32.partialorder %v2713_v8, 8.507059e+37 }
 0x2fa   : > { %v3679_v61 = vpop.eup %3678 }
 0x2fb   : > { %v2705_v4 = vmul.f32 %v3679_v61, %v2703_v44  ;;  %vm2710_vm8 = vweird.f32 %v3679_v61 }
 0x2fc   : > { %vm2711_vm10 = vmor %vm2709_vm9, %vm2710_vm8 }
 0x2fd   : > { %v2706_v60 = vsub.f32 1.0, %v2705_v4 }
 0x2ff   : > { %v2707_v11 = vmul.f32 %v3679_v61, %v2706_v60 }
 0x301   : > { %v2708_v2 = vadd.f32 %v3679_v61, %v2707_v11 }
 0x303   : > { %v2712_v45 = vsel %vm2711_vm10, %v3679_v61, %v2708_v2 }
 0x304   : > { %v2717_v19 = vsel %vm2714_vm11, %v2716_v14, %v2712_v45 }
 0x305   : > { %2735 = vrot.lane.b32.xlu1 %v2717_v19, %s3762_s10  ;;  %v2719_v7 = vmax.f32 %v2717_v19, 1e-07 }
 0x307   : > { %v2720_v49 = vmin.f32 %v2719_v7, 0.9999999 }
 0x309   : > { %v2723_v0 = vsel %vm2722_vm13, %v2720_v49, 0.0 }
 0x30a   : > { %v2724_v12 = vrot.slane %v2723_v0, 4 }
 0x30c   : > { %v2725_v22 = vadd.f32 %v2724_v12, %v2723_v0 }
 0x30e   : > { %v2726_v9 = vrot.slane %v2725_v22, 2 }
 0x310   : > { %v2727_v24 = vadd.f32 %v2726_v9, %v2725_v22 }
 0x312   : > { %v2728_v43 = vrot.slane %v2727_v24, 1 }
 0x314   : > { %v2729_v62 = vadd.f32 %v2728_v43, %v2727_v24 }
 0x316   : > { %v2730_v39 = vadd.f32 %v2729_v62, %v2721_v40 }
 0x318   : > { %2732 = vst.msk [vmem:[#allocation2] sm:$0x1] %vm2731_vm14, %v2730_v39 }
 0x377   : > { %v2736_v56 = vpop.permute.xlu1 %2735 }
 0x378   : > { %v2738_v63 = vmul.f32 %v2736_v56, %v2720_v49 }
 0x37a   : > { %v2739_v59 = vsel %vm2722_vm13, %v2738_v63, 0.0 }
 0x37b   : > { %v2740_v10 = vrot.slane %v2739_v59, 4 }
 0x37d   : > { %v2741_v46 = vadd.f32 %v2740_v10, %v2739_v59 }
 0x37f   : > { %v2742_v31 = vrot.slane %v2741_v46, 2 }
 0x381   : > { %v2743_v15 = vadd.f32 %v2742_v31, %v2741_v46 }
 0x383   : > { %v2744_v6 = vrot.slane %v2743_v15, 1 }
 0x385   : > { %v2745_v54 = vadd.f32 %v2744_v6, %v2743_v15  ;;  %2751 = sbr.rel (%p3348_p11) target bundleno = 927 (0x39f), region = 60 }
 0x387   : > { %v2746_v21 = vadd.f32 %v2745_v54, %v2733_v58 }
 0x389   : > { %2747 = vst.msk [vmem:[#allocation3] sm:$0x1] %vm2731_vm14, %v2746_v21 }
 0x38a   : > { %v2753_v20 = vld [vmem:[#allocation2] sm:$0x1] }
 0x38b   : > { %3680 = vrcp.f32 %v2753_v20  ;;  %v2765_v3 = vand.u32 2147483648, %v2753_v20  ;;  %vm2759_vm15 = vweird.f32 %v2753_v20  ;;  %v2763_v57 = vand.u32 2147483647, %v2753_v20 }
 0x38d   : > { %v2766_v23 = vor.u32 1.1754944e-38, %v2765_v3  ;;  %vm2764_vm1 = vcmp.eq.f32.partialorder %v2763_v57, 8.507059e+37 }
 0x390   : > { %v2752_v42 = vld [vmem:[#allocation3] sm:$0x1] }
 0x391   : > { %v3681_v35 = vpop.eup %3680 }
 0x392   : > { %v2755_v52 = vmul.f32 %v3681_v35, %v2753_v20  ;;  %vm2760_vm0 = vweird.f32 %v3681_v35 }
 0x393   : > { %vm2761_vm12 = vmor %vm2759_vm15, %vm2760_vm0 }
 0x394   : > { %v2756_v50 = vsub.f32 1.0, %v2755_v52 }
 0x396   : > { %v2757_v55 = vmul.f32 %v3681_v35, %v2756_v50 }
 0x398   : > { %v2758_v1 = vadd.f32 %v3681_v35, %v2757_v55 }
 0x39a   : > { %v2762_v36 = vsel %vm2761_vm12, %v3681_v35, %v2758_v1 }
 0x39b   : > { %v2767_v25 = vsel %vm2764_vm1, %v2766_v23, %v2762_v36 }
 0x39c   : > { %v2768_v47 = vmul.f32 %v2767_v25, %v2752_v42 }
 0x39e   : > { %2769 = vst.msk [vmem:[%s314_s22] sm:$0x1] %vm2731_vm14, %v2768_v47 }
 0x39f PF: > { %s18_s28 = sadd.s32 1, %s3754_s28   ;;  %s5585_s24 = smov %s3746_s26 }
 0x3a0   : > { %p15_p12 = scmp.ge.s32.totalorder %s18_s28, 6   ;;  %s5586_s25 = smov %s3750_s27 }
 0x3a1   : > { %s5587_s26 = smov %s5590_s30  ;;  %s5588_s27 = smov %s5594_s8 }
 0x3a2   :  { %17 = sbr.rel (!%p15_p12) target bundleno = 3 (0x3), region = 91 }
 0x3a7   :  { %2787 = vsyncpa [#allocation5], 1 }
 0x3a8   :  { %2789 = vsyncpa [#allocation5 + $0x1], 1 }

</bundles_post_ra>
